<compile_context>
chip_gen: v7x
topology: tpu7x:2x2x1
jax: 0.10.0
libtpu: 0.0.40
codegen_flags: <defaults>
</compile_context>

<pallas_src>
import math
import numpy as np

import jax
import jax.numpy as jnp
from jax.experimental import pallas as pl
from jax.experimental.pallas import tpu as pltpu  # noqa: F401  (TPU backend assumed)

# ----------------------------- synthetic config ------------------------------
SEQ = 8
BATCH = 2
HIDDEN = 32
HEADS = 2
HEAD_DIM = HIDDEN // HEADS          # 16
FFN = 64                            # ffn_hidden_size
NUM_GLOBAL_LAYERS = 2               # global_num_encoders
ROT_DIM = HEAD_DIM // 2             # dims per head that get rotated (ChatGLM rope)
EPS = 1e-5
SCALE = 1.0 / math.sqrt(HEAD_DIM)
NEG_INF = -1e30
ROWS = SEQ * BATCH                  # batch folded into the sublane (M) dimension
OUT_COLS = (2 * NUM_GLOBAL_LAYERS + 1) * HIDDEN   # KV slab (2*L*H) + final hidden (H)


# ------------------------------- kernel body ---------------------------------
def glm_transformer_kernel(
    x_ref, cos_ref, sin_ref, p_ref, bias_ref,
    ln1_ref, ln2_ref, wqkv_ref, bqkv_ref, wdense_ref, wh4h_ref, w4hh_ref, fln_ref,
    out_ref,
):
    """All NUM_GLOBAL_LAYERS GLM blocks + final RMSNorm on a [S*B, H] slab.

    out_ref layout (lane-packed, single writeback):
      [:, 2*l*H : (2*l+1)*H]      = K of layer l
      [:, (2*l+1)*H : (2*l+2)*H]  = V of layer l
      [:, 2*L*H : (2*L+1)*H]      = final hidden states (after final RMSNorm)
    """
    h = x_ref[...]                          # [R, H] residual stream (row = s*B + b)
    cos = cos_ref[...]                      # [R, H]
    sin = sin_ref[...]                      # [R, H]
    P = p_ref[...]                          # [H, H] signed pair-swap permutation
    bias = bias_ref[...]                    # [R, R] additive mask (causal + batch-block)

    def rms(x, w):
        # ChatGLM RMSNorm: x * rsqrt(mean(x^2) + eps) * weight
        var = jnp.mean(x * x, axis=-1, keepdims=True)
        return x * jax.lax.rsqrt(var + EPS) * w

    def rope(x):
        # interleaved pair rotation: y[2i] = x[2i]*c - x[2i+1]*s ; y[2i+1] = x[2i+1]*c + x[2i]*s
        return x * cos + jnp.dot(x, P, preferred_element_type=jnp.float32) * sin

    for l in range(NUM_GLOBAL_LAYERS):      # unrolled: all weights stay VMEM-resident
        # ---- input RMSNorm + fused QKV projection (bias = add_qkv_bias) ----
        ln1 = rms(h, ln1_ref[l])
        qkv = jnp.dot(ln1, wqkv_ref[l], preferred_element_type=jnp.float32) + bqkv_ref[l]
        q = rope(qkv[:, :HIDDEN])
        k = rope(qkv[:, HIDDEN:2 * HIDDEN])
        v = qkv[:, 2 * HIDDEN:]

        # ---- kv cache (presents): lane-packed slab slice, static offsets ----
        out_ref[:, 2 * l * HIDDEN:(2 * l + 1) * HIDDEN] = k
        out_ref[:, (2 * l + 1) * HIDDEN:(2 * l + 2) * HIDDEN] = v

        # ---- attention over the batch-folded slab (cross-batch terms are masked out) ----
        wd = wdense_ref[l]                  # [H, H]
        attn_out = None
        for hh in range(HEADS):
            lo, hi = hh * HEAD_DIM, (hh + 1) * HEAD_DIM
            qh, kh, vh = q[:, lo:hi], k[:, lo:hi], v[:, lo:hi]
            s = jnp.dot(qh, kh.T, preferred_element_type=jnp.float32) * SCALE + bias
            m = jnp.max(s, axis=-1, keepdims=True)
            e = jnp.exp(s - m)
            p_attn = e * pl.reciprocal(jnp.sum(e, axis=-1, keepdims=True), approx=True)
            ctx = jnp.dot(p_attn, vh, preferred_element_type=jnp.float32)
            # fold this head's slice of the output projection (no concat / lane relayout)
            part = jnp.dot(ctx, wd[lo:hi, :], preferred_element_type=jnp.float32)
            attn_out = part if attn_out is None else attn_out + part

        # residual (hidden_dropout = 0.0 / eval mode -> identity); add_bias_linear=False
        h = h + attn_out

        # ---- post-attention RMSNorm + SwiGLU MLP ----
        ln2 = rms(h, ln2_ref[l])
        mlp_in = jnp.dot(ln2, wh4h_ref[l], preferred_element_type=jnp.float32)  # [R, 2F]
        x0 = mlp_in[:, :FFN]
        x1 = mlp_in[:, FFN:]
        gated = x0 * jax.nn.sigmoid(x0) * x1              # silu(x0) * x1
        h = h + jnp.dot(gated, w4hh_ref[l], preferred_element_type=jnp.float32)

    # ---- final RMSNorm (post_layer_norm=True), written into the packed output slab ----
    base = 2 * NUM_GLOBAL_LAYERS * HIDDEN
    out_ref[:, base:base + HIDDEN] = rms(h, fln_ref[...])


# ------------------------------ glue / wrapper --------------------------------
def build_rope_operands(rope_cache, batch):
    """rope_cache: [S, HEAD_DIM//4, 2] (cos, sin per rotated pair) ->
       COS, SIN of shape [S*B, HIDDEN] (rows match the folded (s, b) layout) and the
       signed pair-swap permutation P [HIDDEN, HIDDEN] so that
       rope(x) = x*COS + (x @ P)*SIN reproduces ChatGLM's interleaved RoPE."""
    rope = np.asarray(rope_cache, dtype=np.float32)                  # [S, npairs, 2]
    seq, npairs = rope.shape[0], rope.shape[1]
    rot = 2 * npairs                                                 # rotated dims per head
    cos_p, sin_p = rope[..., 0], rope[..., 1]                        # [S, npairs]
    cos_head = np.concatenate(
        [np.repeat(cos_p, 2, axis=-1), np.ones((seq, HEAD_DIM - rot), np.float32)], axis=-1)
    sin_head = np.concatenate(
        [np.repeat(sin_p, 2, axis=-1), np.zeros((seq, HEAD_DIM - rot), np.float32)], axis=-1)
    # per-head pattern tiled over heads, then each position repeated B times (row = s*B + b)
    COS = np.repeat(np.tile(cos_head, (1, HEADS)), batch, axis=0).astype(np.float32)  # [S*B, H]
    SIN = np.repeat(np.tile(sin_head, (1, HEADS)), batch, axis=0).astype(np.float32)
    # y = x @ P: y[2i] = -x[2i+1], y[2i+1] = x[2i] on rotated dims, 0 on pass-through dims
    Pb = np.zeros((HEAD_DIM, HEAD_DIM), np.float32)
    for i in range(npairs):
        Pb[2 * i + 1, 2 * i] = -1.0
        Pb[2 * i, 2 * i + 1] = 1.0
    P = np.zeros((HIDDEN, HIDDEN), np.float32)
    for hh in range(HEADS):
        P[hh * HEAD_DIM:(hh + 1) * HEAD_DIM, hh * HEAD_DIM:(hh + 1) * HEAD_DIM] = Pb
    return jnp.asarray(COS), jnp.asarray(SIN), jnp.asarray(P)


def build_attention_bias(attention_mask):
    """attention_mask: bool [B, 1, S, S], True = masked.  Returns an additive bias of
       shape [S*B, S*B] for the batch-folded slab: 0 where query (s, b) may attend key
       (t, b') (same batch element and not masked), NEG_INF elsewhere."""
    b = attention_mask.shape[0]
    s = attention_mask.shape[-1]
    not_masked = ~attention_mask[:, 0]                               # [B, S, T]
    nm_sbt = jnp.transpose(not_masked, (1, 0, 2))                    # [S, B, T]
    same_batch = jnp.eye(b, dtype=bool)                              # [B, B']
    allowed = nm_sbt[:, :, :, None] & same_batch[None, :, None, :]   # [S, B, T, B']
    return jnp.where(allowed.reshape(s * b, s * b), 0.0, NEG_INF).astype(jnp.float32)


def global_glm_transformer(hidden_states, attention_mask, rotary_pos_emb, params,
                           use_cache=True, output_hidden_states=False):
    """hidden_states: [seq, batch, hidden] (ChatGLM layout)
       attention_mask: bool [batch, 1, seq, seq], True = masked
       rotary_pos_emb: [seq, HEAD_DIM//4, 2]"""
    # TODO(synk): output_hidden_states collection (all_hidden_states) not wired through the
    #             kernel; returns None like the default path.
    seq, batch, hid = hidden_states.shape
    rows = seq * batch
    # Free reshape of the native [S, B, H] layout -> [S*B, H] slab (row = s*B + b); no transpose.
    x2d = hidden_states.reshape(rows, hid).astype(jnp.float32)
    cos, sin, P = build_rope_operands(rotary_pos_emb, batch)
    bias = build_attention_bias(attention_mask)

    # Single lane-packed output slab: [R, 2*L*H (presents) + H (final hidden states)]
    out_shape = jax.ShapeDtypeStruct((rows, 2 * NUM_GLOBAL_LAYERS * hid + hid), jnp.float32)

    # Grid-less call: every operand lives in VMEM for the whole fused forward pass.
    slab = pl.pallas_call(glm_transformer_kernel, out_shape=out_shape)(
        x2d, cos, sin, P, bias,
        params["ln1_w"], params["ln2_w"], params["w_qkv"], params["b_qkv"],
        params["w_dense"], params["w_h4h"], params["w_4hh"], params["final_ln_w"],
    )

    base = 2 * NUM_GLOBAL_LAYERS * hid
    hidden_out = slab[:, base:base + hid].reshape(seq, batch, hid)   # back to [S, B, H]
    presents = None
    if use_cache:
        presents = tuple(
            (slab[:, 2 * l * hid:(2 * l + 1) * hid].reshape(seq, batch, HEADS, HEAD_DIM),
             slab[:, (2 * l + 1) * hid:(2 * l + 2) * hid].reshape(seq, batch, HEADS, HEAD_DIM))
            for l in range(NUM_GLOBAL_LAYERS))
    all_hidden_states = None
    all_self_attentions = None
    return hidden_out, presents, all_hidden_states, all_self_attentions


# ------------------------- deterministic parameter init -----------------------
def init_params(key):
    ks = jax.random.split(key, 6)
    L = NUM_GLOBAL_LAYERS
    std = 0.02
    return {
        "ln1_w": jnp.ones((L, 1, HIDDEN), jnp.float32),
        "ln2_w": jnp.ones((L, 1, HIDDEN), jnp.float32),
        "w_qkv": std * jax.random.normal(ks[0], (L, HIDDEN, 3 * HIDDEN), jnp.float32),
        "b_qkv": std * jax.random.normal(ks[1], (L, 1, 3 * HIDDEN), jnp.float32),
        "w_dense": std * jax.random.normal(ks[2], (L, HIDDEN, HIDDEN), jnp.float32),
        "w_h4h": std * jax.random.normal(ks[3], (L, HIDDEN, 2 * FFN), jnp.float32),
        "w_4hh": std * jax.random.normal(ks[4], (L, FFN, HIDDEN), jnp.float32),
        "final_ln_w": jnp.ones((1, HIDDEN), jnp.float32),
    }


def make_rotary_pos_emb(seq_len):
    # ChatGLM RotaryEmbedding(dim = head_dim // 2): theta over even indices of `dim`
    dim = HEAD_DIM // 2
    theta = 1.0 / (10000.0 ** (np.arange(0, dim, 2, dtype=np.float32) / dim))  # [dim//2]
    pos = np.arange(seq_len, dtype=np.float32)
    idx = np.outer(pos, theta)                                                  # [S, dim//2]
    cache = np.stack([np.cos(idx), np.sin(idx)], axis=-1).astype(np.float32)    # [S, dim//2, 2]
    return jnp.asarray(cache)


# ------------------------------------ main ------------------------------------
if __name__ == "__main__":
    key = jax.random.PRNGKey(0)
    k_h, k_p = jax.random.split(key)

    hidden_states = jax.random.normal(k_h, (SEQ, BATCH, HIDDEN), jnp.float32)   # [S, B, H]
    # causal mask, True = masked (ChatGLM convention)
    causal = ~np.tril(np.ones((SEQ, SEQ), dtype=bool))
    attention_mask = jnp.asarray(np.broadcast_to(causal, (BATCH, 1, SEQ, SEQ)))
    rotary_pos_emb = make_rotary_pos_emb(SEQ)                                   # [S, HEAD_DIM//4, 2]

    params = init_params(k_p)

    out, presents, all_hs, all_attn = global_glm_transformer(
        hidden_states, attention_mask, rotary_pos_emb, params, use_cache=True)

    jax.block_until_ready(out)
    for kv_pair in presents:
        jax.block_until_ready(kv_pair[0])
        jax.block_until_ready(kv_pair[1])

    assert out.shape == (SEQ, BATCH, HIDDEN)
    assert len(presents) == NUM_GLOBAL_LAYERS
    assert presents[0][0].shape == (SEQ, BATCH, HEADS, HEAD_DIM)
    assert presents[0][1].shape == (SEQ, BATCH, HEADS, HEAD_DIM)
    assert bool(jnp.all(jnp.isfinite(out)))
    print("KERNEL_OK")
</pallas_src>

<mosaic_0001>
module attributes {stable_mosaic.version = 11 : i64} {
  func.func @glm_transformer_kernel(%arg0: memref<16x32xf32, #tpu.memory_space<vmem>>, %arg1: memref<16x32xf32, #tpu.memory_space<vmem>>, %arg2: memref<16x32xf32, #tpu.memory_space<vmem>>, %arg3: memref<32x32xf32, #tpu.memory_space<vmem>>, %arg4: memref<16x16xf32, #tpu.memory_space<vmem>>, %arg5: memref<2x1x32xf32, #tpu.memory_space<vmem>>, %arg6: memref<2x1x32xf32, #tpu.memory_space<vmem>>, %arg7: memref<2x32x96xf32, #tpu.memory_space<vmem>>, %arg8: memref<2x1x96xf32, #tpu.memory_space<vmem>>, %arg9: memref<2x32x32xf32, #tpu.memory_space<vmem>>, %arg10: memref<2x32x128xf32, #tpu.memory_space<vmem>>, %arg11: memref<2x64x32xf32, #tpu.memory_space<vmem>>, %arg12: memref<1x32xf32, #tpu.memory_space<vmem>>, %arg13: memref<16x160xf32, #tpu.memory_space<vmem>>) attributes {dimension_semantics = [], scalar_prefetch = 0 : i64, scratch_operands = 0 : i64, tpu.core_type = #tpu.core_type<tc>} {
    %c0 = arith.constant 0 : index
    %c0_0 = arith.constant 0 : index
    %0 = vector.load %arg0[%c0, %c0_0] : memref<16x32xf32, #tpu.memory_space<vmem>>, vector<16x32xf32>
    %c0_1 = arith.constant 0 : index
    %c0_2 = arith.constant 0 : index
    %1 = vector.load %arg1[%c0_1, %c0_2] : memref<16x32xf32, #tpu.memory_space<vmem>>, vector<16x32xf32>
    %c0_3 = arith.constant 0 : index
    %c0_4 = arith.constant 0 : index
    %2 = vector.load %arg2[%c0_3, %c0_4] : memref<16x32xf32, #tpu.memory_space<vmem>>, vector<16x32xf32>
    %c0_5 = arith.constant 0 : index
    %c0_6 = arith.constant 0 : index
    %3 = vector.load %arg3[%c0_5, %c0_6] : memref<32x32xf32, #tpu.memory_space<vmem>>, vector<32x32xf32>
    %c0_7 = arith.constant 0 : index
    %c0_8 = arith.constant 0 : index
    %4 = vector.load %arg4[%c0_7, %c0_8] : memref<16x16xf32, #tpu.memory_space<vmem>>, vector<16x16xf32>
    %c0_9 = arith.constant 0 : index
    %c0_10 = arith.constant 0 : index
    %c0_11 = arith.constant 0 : index
    %5 = vector.load %arg5[%c0_9, %c0_10, %c0_11] : memref<2x1x32xf32, #tpu.memory_space<vmem>>, vector<1x1x32xf32>
    %6 = vector.shape_cast %5 : vector<1x1x32xf32> to vector<1x32xf32>
    %7 = arith.mulf %0, %0 : vector<16x32xf32>
    %cst = arith.constant dense<0.000000e+00> : vector<16xf32>
    %8 = vector.multi_reduction <add>, %7, %cst [1] : vector<16x32xf32> to vector<16xf32>
    %9 = vector.shape_cast %8 : vector<16xf32> to vector<16x1xf32>
    %cst_12 = arith.constant 3.200000e+01 : f32
    %10 = vector.broadcast %cst_12 : f32 to vector<16x1xf32>
    %11 = arith.divf %9, %10 : vector<16x1xf32>
    %cst_13 = arith.constant 9.99999974E-6 : f32
    %12 = vector.broadcast %cst_13 : f32 to vector<16x1xf32>
    %13 = arith.addf %11, %12 : vector<16x1xf32>
    %14 = math.rsqrt %13 : vector<16x1xf32>
    %15 = vector.broadcast %14 : vector<16x1xf32> to vector<16x32xf32>
    %16 = arith.mulf %0, %15 : vector<16x32xf32>
    %17 = vector.broadcast %6 : vector<1x32xf32> to vector<16x32xf32>
    %18 = arith.mulf %16, %17 : vector<16x32xf32>
    %c0_14 = arith.constant 0 : index
    %c0_15 = arith.constant 0 : index
    %c0_16 = arith.constant 0 : index
    %19 = vector.load %arg7[%c0_14, %c0_15, %c0_16] : memref<2x32x96xf32, #tpu.memory_space<vmem>>, vector<1x32x96xf32>
    %20 = vector.shape_cast %19 : vector<1x32x96xf32> to vector<32x96xf32>
    %cst_17 = arith.constant dense<0.000000e+00> : vector<16x96xf32>
    %21 = tpu.matmul %18, %20, %cst_17 {dimension_numbers = #tpu.dot_dimension_numbers<[1], [0], [0], [1], [0, 0, 1, 1], [], []>} : vector<16x32xf32>, vector<32x96xf32>, vector<16x96xf32> -> vector<16x96xf32>
    %c0_18 = arith.constant 0 : index
    %c0_19 = arith.constant 0 : index
    %c0_20 = arith.constant 0 : index
    %22 = vector.load %arg8[%c0_18, %c0_19, %c0_20] : memref<2x1x96xf32, #tpu.memory_space<vmem>>, vector<1x1x96xf32>
    %23 = vector.shape_cast %22 : vector<1x1x96xf32> to vector<1x96xf32>
    %24 = vector.broadcast %23 : vector<1x96xf32> to vector<16x96xf32>
    %25 = arith.addf %21, %24 : vector<16x96xf32>
    %26 = vector.extract_strided_slice %25 {offsets = [0, 0], sizes = [16, 32], strides = [1, 1]} : vector<16x96xf32> to vector<16x32xf32>
    %27 = arith.mulf %26, %1 : vector<16x32xf32>
    %cst_21 = arith.constant dense<0.000000e+00> : vector<16x32xf32>
    %28 = tpu.matmul %26, %3, %cst_21 {dimension_numbers = #tpu.dot_dimension_numbers<[1], [0], [0], [1], [0, 0, 1, 1], [], []>} : vector<16x32xf32>, vector<32x32xf32>, vector<16x32xf32> -> vector<16x32xf32>
    %29 = arith.mulf %28, %2 : vector<16x32xf32>
    %30 = arith.addf %27, %29 : vector<16x32xf32>
    %31 = vector.extract_strided_slice %25 {offsets = [0, 32], sizes = [16, 32], strides = [1, 1]} : vector<16x96xf32> to vector<16x32xf32>
    %32 = arith.mulf %31, %1 : vector<16x32xf32>
    %cst_22 = arith.constant dense<0.000000e+00> : vector<16x32xf32>
    %33 = tpu.matmul %31, %3, %cst_22 {dimension_numbers = #tpu.dot_dimension_numbers<[1], [0], [0], [1], [0, 0, 1, 1], [], []>} : vector<16x32xf32>, vector<32x32xf32>, vector<16x32xf32> -> vector<16x32xf32>
    %34 = arith.mulf %33, %2 : vector<16x32xf32>
    %35 = arith.addf %32, %34 : vector<16x32xf32>
    %36 = vector.extract_strided_slice %25 {offsets = [0, 64], sizes = [16, 32], strides = [1, 1]} : vector<16x96xf32> to vector<16x32xf32>
    %c0_23 = arith.constant 0 : index
    %c0_24 = arith.constant 0 : index
    %37 = vector.load %arg13[%c0_23, %c0_24] : memref<16x160xf32, #tpu.memory_space<vmem>>, vector<16x32xf32>
    tpu.vector_store %arg13[%c0_23, %c0_24], %35 {strides = array<i32>} : memref<16x160xf32, #tpu.memory_space<vmem>>, vector<16x32xf32>,
    %c0_25 = arith.constant 0 : index
    %c32 = arith.constant 32 : index
    %38 = vector.load %arg13[%c0_25, %c32] : memref<16x160xf32, #tpu.memory_space<vmem>>, vector<16x32xf32>
    tpu.vector_store %arg13[%c0_25, %c32], %36 {strides = array<i32>} : memref<16x160xf32, #tpu.memory_space<vmem>>, vector<16x32xf32>,
    %c0_26 = arith.constant 0 : index
    %c0_27 = arith.constant 0 : index
    %c0_28 = arith.constant 0 : index
    %39 = vector.load %arg9[%c0_26, %c0_27, %c0_28] : memref<2x32x32xf32, #tpu.memory_space<vmem>>, vector<1x32x32xf32>
    %40 = vector.shape_cast %39 : vector<1x32x32xf32> to vector<32x32xf32>
    %41 = vector.extract_strided_slice %30 {offsets = [0, 0], sizes = [16, 16], strides = [1, 1]} : vector<16x32xf32> to vector<16x16xf32>
    %42 = vector.extract_strided_slice %35 {offsets = [0, 0], sizes = [16, 16], strides = [1, 1]} : vector<16x32xf32> to vector<16x16xf32>
    %43 = vector.extract_strided_slice %36 {offsets = [0, 0], sizes = [16, 16], strides = [1, 1]} : vector<16x32xf32> to vector<16x16xf32>
    %44 = tpu.transpose %42, [1, 0] : vector<16x16xf32> -> vector<16x16xf32>
    %cst_29 = arith.constant dense<0.000000e+00> : vector<16x16xf32>
    %45 = tpu.matmul %41, %44, %cst_29 {dimension_numbers = #tpu.dot_dimension_numbers<[1], [0], [0], [1], [0, 0, 1, 1], [], []>} : vector<16x16xf32>, vector<16x16xf32>, vector<16x16xf32> -> vector<16x16xf32>
    %cst_30 = arith.constant 2.500000e-01 : f32
    %46 = vector.broadcast %cst_30 : f32 to vector<16x16xf32>
    %47 = arith.mulf %45, %46 : vector<16x16xf32>
    %48 = arith.addf %47, %4 : vector<16x16xf32>
    %cst_31 = arith.constant dense<0xFF800000> : vector<16xf32>
    %49 = vector.multi_reduction <maximumf>, %48, %cst_31 [1] : vector<16x16xf32> to vector<16xf32>
    %50 = vector.shape_cast %49 : vector<16xf32> to vector<16x1xf32>
    %51 = vector.broadcast %50 : vector<16x1xf32> to vector<16x16xf32>
    %52 = arith.subf %48, %51 : vector<16x16xf32>
    %53 = math.exp %52 : vector<16x16xf32>
    %cst_32 = arith.constant dense<0.000000e+00> : vector<16xf32>
    %54 = vector.multi_reduction <add>, %53, %cst_32 [1] : vector<16x16xf32> to vector<16xf32>
    %55 = vector.shape_cast %54 : vector<16xf32> to vector<16x1xf32>
    %56 = tpu.reciprocal %55 {approx = true} : vector<16x1xf32> -> vector<16x1xf32>
    %57 = vector.broadcast %56 : vector<16x1xf32> to vector<16x16xf32>
    %58 = arith.mulf %53, %57 : vector<16x16xf32>
    %cst_33 = arith.constant dense<0.000000e+00> : vector<16x16xf32>
    %59 = tpu.matmul %58, %43, %cst_33 {dimension_numbers = #tpu.dot_dimension_numbers<[1], [0], [0], [1], [0, 0, 1, 1], [], []>} : vector<16x16xf32>, vector<16x16xf32>, vector<16x16xf32> -> vector<16x16xf32>
    %60 = vector.extract_strided_slice %40 {offsets = [0, 0], sizes = [16, 32], strides = [1, 1]} : vector<32x32xf32> to vector<16x32xf32>
    %cst_34 = arith.constant dense<0.000000e+00> : vector<16x32xf32>
    %61 = tpu.matmul %59, %60, %cst_34 {dimension_numbers = #tpu.dot_dimension_numbers<[1], [0], [0], [1], [0, 0, 1, 1], [], []>} : vector<16x16xf32>, vector<16x32xf32>, vector<16x32xf32> -> vector<16x32xf32>
    %62 = vector.extract_strided_slice %30 {offsets = [0, 16], sizes = [16, 16], strides = [1, 1]} : vector<16x32xf32> to vector<16x16xf32>
    %63 = vector.extract_strided_slice %35 {offsets = [0, 16], sizes = [16, 16], strides = [1, 1]} : vector<16x32xf32> to vector<16x16xf32>
    %64 = vector.extract_strided_slice %36 {offsets = [0, 16], sizes = [16, 16], strides = [1, 1]} : vector<16x32xf32> to vector<16x16xf32>
    %65 = tpu.transpose %63, [1, 0] : vector<16x16xf32> -> vector<16x16xf32>
    %cst_35 = arith.constant dense<0.000000e+00> : vector<16x16xf32>
    %66 = tpu.matmul %62, %65, %cst_35 {dimension_numbers = #tpu.dot_dimension_numbers<[1], [0], [0], [1], [0, 0, 1, 1], [], []>} : vector<16x16xf32>, vector<16x16xf32>, vector<16x16xf32> -> vector<16x16xf32>
    %cst_36 = arith.constant 2.500000e-01 : f32
    %67 = vector.broadcast %cst_36 : f32 to vector<16x16xf32>
    %68 = arith.mulf %66, %67 : vector<16x16xf32>
    %69 = arith.addf %68, %4 : vector<16x16xf32>
    %cst_37 = arith.constant dense<0xFF800000> : vector<16xf32>
    %70 = vector.multi_reduction <maximumf>, %69, %cst_37 [1] : vector<16x16xf32> to vector<16xf32>
    %71 = vector.shape_cast %70 : vector<16xf32> to vector<16x1xf32>
    %72 = vector.broadcast %71 : vector<16x1xf32> to vector<16x16xf32>
    %73 = arith.subf %69, %72 : vector<16x16xf32>
    %74 = math.exp %73 : vector<16x16xf32>
    %cst_38 = arith.constant dense<0.000000e+00> : vector<16xf32>
    %75 = vector.multi_reduction <add>, %74, %cst_38 [1] : vector<16x16xf32> to vector<16xf32>
    %76 = vector.shape_cast %75 : vector<16xf32> to vector<16x1xf32>
    %77 = tpu.reciprocal %76 {approx = true} : vector<16x1xf32> -> vector<16x1xf32>
    %78 = vector.broadcast %77 : vector<16x1xf32> to vector<16x16xf32>
    %79 = arith.mulf %74, %78 : vector<16x16xf32>
    %cst_39 = arith.constant dense<0.000000e+00> : vector<16x16xf32>
    %80 = tpu.matmul %79, %64, %cst_39 {dimension_numbers = #tpu.dot_dimension_numbers<[1], [0], [0], [1], [0, 0, 1, 1], [], []>} : vector<16x16xf32>, vector<16x16xf32>, vector<16x16xf32> -> vector<16x16xf32>
    %81 = vector.extract_strided_slice %40 {offsets = [16, 0], sizes = [16, 32], strides = [1, 1]} : vector<32x32xf32> to vector<16x32xf32>
    %cst_40 = arith.constant dense<0.000000e+00> : vector<16x32xf32>
    %82 = tpu.matmul %80, %81, %cst_40 {dimension_numbers = #tpu.dot_dimension_numbers<[1], [0], [0], [1], [0, 0, 1, 1], [], []>} : vector<16x16xf32>, vector<16x32xf32>, vector<16x32xf32> -> vector<16x32xf32>
    %83 = arith.addf %61, %82 : vector<16x32xf32>
    %84 = arith.addf %0, %83 : vector<16x32xf32>
    %c0_41 = arith.constant 0 : index
    %c0_42 = arith.constant 0 : index
    %c0_43 = arith.constant 0 : index
    %85 = vector.load %arg6[%c0_41, %c0_42, %c0_43] : memref<2x1x32xf32, #tpu.memory_space<vmem>>, vector<1x1x32xf32>
    %86 = vector.shape_cast %85 : vector<1x1x32xf32> to vector<1x32xf32>
    %87 = arith.mulf %84, %84 : vector<16x32xf32>
    %cst_44 = arith.constant dense<0.000000e+00> : vector<16xf32>
    %88 = vector.multi_reduction <add>, %87, %cst_44 [1] : vector<16x32xf32> to vector<16xf32>
    %89 = vector.shape_cast %88 : vector<16xf32> to vector<16x1xf32>
    %cst_45 = arith.constant 3.200000e+01 : f32
    %90 = vector.broadcast %cst_45 : f32 to vector<16x1xf32>
    %91 = arith.divf %89, %90 : vector<16x1xf32>
    %cst_46 = arith.constant 9.99999974E-6 : f32
    %92 = vector.broadcast %cst_46 : f32 to vector<16x1xf32>
    %93 = arith.addf %91, %92 : vector<16x1xf32>
    %94 = math.rsqrt %93 : vector<16x1xf32>
    %95 = vector.broadcast %94 : vector<16x1xf32> to vector<16x32xf32>
    %96 = arith.mulf %84, %95 : vector<16x32xf32>
    %97 = vector.broadcast %86 : vector<1x32xf32> to vector<16x32xf32>
    %98 = arith.mulf %96, %97 : vector<16x32xf32>
    %c0_47 = arith.constant 0 : index
    %c0_48 = arith.constant 0 : index
    %c0_49 = arith.constant 0 : index
    %99 = vector.load %arg10[%c0_47, %c0_48, %c0_49] : memref<2x32x128xf32, #tpu.memory_space<vmem>>, vector<1x32x128xf32>
    %100 = vector.shape_cast %99 : vector<1x32x128xf32> to vector<32x128xf32>
    %cst_50 = arith.constant dense<0.000000e+00> : vector<16x128xf32>
    %101 = tpu.matmul %98, %100, %cst_50 {dimension_numbers = #tpu.dot_dimension_numbers<[1], [0], [0], [1], [0, 0, 1, 1], [], []>} : vector<16x32xf32>, vector<32x128xf32>, vector<16x128xf32> -> vector<16x128xf32>
    %102 = vector.extract_strided_slice %101 {offsets = [0, 0], sizes = [16, 64], strides = [1, 1]} : vector<16x128xf32> to vector<16x64xf32>
    %103 = vector.extract_strided_slice %101 {offsets = [0, 64], sizes = [16, 64], strides = [1, 1]} : vector<16x128xf32> to vector<16x64xf32>
    %104 = arith.negf %102 : vector<16x64xf32>
    %105 = math.exp %104 : vector<16x64xf32>
    %cst_51 = arith.constant 1.000000e+00 : f32
    %106 = vector.broadcast %cst_51 : f32 to vector<16x64xf32>
    %107 = arith.addf %106, %105 : vector<16x64xf32>
    %108 = arith.divf %106, %107 : vector<16x64xf32>
    %109 = arith.mulf %102, %108 : vector<16x64xf32>
    %110 = arith.mulf %109, %103 : vector<16x64xf32>
    %c0_52 = arith.constant 0 : index
    %c0_53 = arith.constant 0 : index
    %c0_54 = arith.constant 0 : index
    %111 = vector.load %arg11[%c0_52, %c0_53, %c0_54] : memref<2x64x32xf32, #tpu.memory_space<vmem>>, vector<1x64x32xf32>
    %112 = vector.shape_cast %111 : vector<1x64x32xf32> to vector<64x32xf32>
    %cst_55 = arith.constant dense<0.000000e+00> : vector<16x32xf32>
    %113 = tpu.matmul %110, %112, %cst_55 {dimension_numbers = #tpu.dot_dimension_numbers<[1], [0], [0], [1], [0, 0, 1, 1], [], []>} : vector<16x64xf32>, vector<64x32xf32>, vector<16x32xf32> -> vector<16x32xf32>
    %114 = arith.addf %84, %113 : vector<16x32xf32>
    %c1 = arith.constant 1 : index
    %c0_56 = arith.constant 0 : index
    %c0_57 = arith.constant 0 : index
    %115 = vector.load %arg5[%c1, %c0_56, %c0_57] : memref<2x1x32xf32, #tpu.memory_space<vmem>>, vector<1x1x32xf32>
    %116 = vector.shape_cast %115 : vector<1x1x32xf32> to vector<1x32xf32>
    %117 = arith.mulf %114, %114 : vector<16x32xf32>
    %cst_58 = arith.constant dense<0.000000e+00> : vector<16xf32>
    %118 = vector.multi_reduction <add>, %117, %cst_58 [1] : vector<16x32xf32> to vector<16xf32>
    %119 = vector.shape_cast %118 : vector<16xf32> to vector<16x1xf32>
    %cst_59 = arith.constant 3.200000e+01 : f32
    %120 = vector.broadcast %cst_59 : f32 to vector<16x1xf32>
    %121 = arith.divf %119, %120 : vector<16x1xf32>
    %cst_60 = arith.constant 9.99999974E-6 : f32
    %122 = vector.broadcast %cst_60 : f32 to vector<16x1xf32>
    %123 = arith.addf %121, %122 : vector<16x1xf32>
    %124 = math.rsqrt %123 : vector<16x1xf32>
    %125 = vector.broadcast %124 : vector<16x1xf32> to vector<16x32xf32>
    %126 = arith.mulf %114, %125 : vector<16x32xf32>
    %127 = vector.broadcast %116 : vector<1x32xf32> to vector<16x32xf32>
    %128 = arith.mulf %126, %127 : vector<16x32xf32>
    %c1_61 = arith.constant 1 : index
    %c0_62 = arith.constant 0 : index
    %c0_63 = arith.constant 0 : index
    %129 = vector.load %arg7[%c1_61, %c0_62, %c0_63] : memref<2x32x96xf32, #tpu.memory_space<vmem>>, vector<1x32x96xf32>
    %130 = vector.shape_cast %129 : vector<1x32x96xf32> to vector<32x96xf32>
    %cst_64 = arith.constant dense<0.000000e+00> : vector<16x96xf32>
    %131 = tpu.matmul %128, %130, %cst_64 {dimension_numbers = #tpu.dot_dimension_numbers<[1], [0], [0], [1], [0, 0, 1, 1], [], []>} : vector<16x32xf32>, vector<32x96xf32>, vector<16x96xf32> -> vector<16x96xf32>
    %c1_65 = arith.constant 1 : index
    %c0_66 = arith.constant 0 : index
    %c0_67 = arith.constant 0 : index
    %132 = vector.load %arg8[%c1_65, %c0_66, %c0_67] : memref<2x1x96xf32, #tpu.memory_space<vmem>>, vector<1x1x96xf32>
    %133 = vector.shape_cast %132 : vector<1x1x96xf32> to vector<1x96xf32>
    %134 = vector.broadcast %133 : vector<1x96xf32> to vector<16x96xf32>
    %135 = arith.addf %131, %134 : vector<16x96xf32>
    %136 = vector.extract_strided_slice %135 {offsets = [0, 0], sizes = [16, 32], strides = [1, 1]} : vector<16x96xf32> to vector<16x32xf32>
    %137 = arith.mulf %136, %1 : vector<16x32xf32>
    %cst_68 = arith.constant dense<0.000000e+00> : vector<16x32xf32>
    %138 = tpu.matmul %136, %3, %cst_68 {dimension_numbers = #tpu.dot_dimension_numbers<[1], [0], [0], [1], [0, 0, 1, 1], [], []>} : vector<16x32xf32>, vector<32x32xf32>, vector<16x32xf32> -> vector<16x32xf32>
    %139 = arith.mulf %138, %2 : vector<16x32xf32>
    %140 = arith.addf %137, %139 : vector<16x32xf32>
    %141 = vector.extract_strided_slice %135 {offsets = [0, 32], sizes = [16, 32], strides = [1, 1]} : vector<16x96xf32> to vector<16x32xf32>
    %142 = arith.mulf %141, %1 : vector<16x32xf32>
    %cst_69 = arith.constant dense<0.000000e+00> : vector<16x32xf32>
    %143 = tpu.matmul %141, %3, %cst_69 {dimension_numbers = #tpu.dot_dimension_numbers<[1], [0], [0], [1], [0, 0, 1, 1], [], []>} : vector<16x32xf32>, vector<32x32xf32>, vector<16x32xf32> -> vector<16x32xf32>
    %144 = arith.mulf %143, %2 : vector<16x32xf32>
    %145 = arith.addf %142, %144 : vector<16x32xf32>
    %146 = vector.extract_strided_slice %135 {offsets = [0, 64], sizes = [16, 32], strides = [1, 1]} : vector<16x96xf32> to vector<16x32xf32>
    %c0_70 = arith.constant 0 : index
    %c64 = arith.constant 64 : index
    %147 = vector.load %arg13[%c0_70, %c64] : memref<16x160xf32, #tpu.memory_space<vmem>>, vector<16x32xf32>
    tpu.vector_store %arg13[%c0_70, %c64], %145 {strides = array<i32>} : memref<16x160xf32, #tpu.memory_space<vmem>>, vector<16x32xf32>,
    %c0_71 = arith.constant 0 : index
    %c96 = arith.constant 96 : index
    %148 = vector.load %arg13[%c0_71, %c96] : memref<16x160xf32, #tpu.memory_space<vmem>>, vector<16x32xf32>
    tpu.vector_store %arg13[%c0_71, %c96], %146 {strides = array<i32>} : memref<16x160xf32, #tpu.memory_space<vmem>>, vector<16x32xf32>,
    %c1_72 = arith.constant 1 : index
    %c0_73 = arith.constant 0 : index
    %c0_74 = arith.constant 0 : index
    %149 = vector.load %arg9[%c1_72, %c0_73, %c0_74] : memref<2x32x32xf32, #tpu.memory_space<vmem>>, vector<1x32x32xf32>
    %150 = vector.shape_cast %149 : vector<1x32x32xf32> to vector<32x32xf32>
    %151 = vector.extract_strided_slice %140 {offsets = [0, 0], sizes = [16, 16], strides = [1, 1]} : vector<16x32xf32> to vector<16x16xf32>
    %152 = vector.extract_strided_slice %145 {offsets = [0, 0], sizes = [16, 16], strides = [1, 1]} : vector<16x32xf32> to vector<16x16xf32>
    %153 = vector.extract_strided_slice %146 {offsets = [0, 0], sizes = [16, 16], strides = [1, 1]} : vector<16x32xf32> to vector<16x16xf32>
    %154 = tpu.transpose %152, [1, 0] : vector<16x16xf32> -> vector<16x16xf32>
    %cst_75 = arith.constant dense<0.000000e+00> : vector<16x16xf32>
    %155 = tpu.matmul %151, %154, %cst_75 {dimension_numbers = #tpu.dot_dimension_numbers<[1], [0], [0], [1], [0, 0, 1, 1], [], []>} : vector<16x16xf32>, vector<16x16xf32>, vector<16x16xf32> -> vector<16x16xf32>
    %cst_76 = arith.constant 2.500000e-01 : f32
    %156 = vector.broadcast %cst_76 : f32 to vector<16x16xf32>
    %157 = arith.mulf %155, %156 : vector<16x16xf32>
    %158 = arith.addf %157, %4 : vector<16x16xf32>
    %cst_77 = arith.constant dense<0xFF800000> : vector<16xf32>
    %159 = vector.multi_reduction <maximumf>, %158, %cst_77 [1] : vector<16x16xf32> to vector<16xf32>
    %160 = vector.shape_cast %159 : vector<16xf32> to vector<16x1xf32>
    %161 = vector.broadcast %160 : vector<16x1xf32> to vector<16x16xf32>
    %162 = arith.subf %158, %161 : vector<16x16xf32>
    %163 = math.exp %162 : vector<16x16xf32>
    %cst_78 = arith.constant dense<0.000000e+00> : vector<16xf32>
    %164 = vector.multi_reduction <add>, %163, %cst_78 [1] : vector<16x16xf32> to vector<16xf32>
    %165 = vector.shape_cast %164 : vector<16xf32> to vector<16x1xf32>
    %166 = tpu.reciprocal %165 {approx = true} : vector<16x1xf32> -> vector<16x1xf32>
    %167 = vector.broadcast %166 : vector<16x1xf32> to vector<16x16xf32>
    %168 = arith.mulf %163, %167 : vector<16x16xf32>
    %cst_79 = arith.constant dense<0.000000e+00> : vector<16x16xf32>
    %169 = tpu.matmul %168, %153, %cst_79 {dimension_numbers = #tpu.dot_dimension_numbers<[1], [0], [0], [1], [0, 0, 1, 1], [], []>} : vector<16x16xf32>, vector<16x16xf32>, vector<16x16xf32> -> vector<16x16xf32>
    %170 = vector.extract_strided_slice %150 {offsets = [0, 0], sizes = [16, 32], strides = [1, 1]} : vector<32x32xf32> to vector<16x32xf32>
    %cst_80 = arith.constant dense<0.000000e+00> : vector<16x32xf32>
    %171 = tpu.matmul %169, %170, %cst_80 {dimension_numbers = #tpu.dot_dimension_numbers<[1], [0], [0], [1], [0, 0, 1, 1], [], []>} : vector<16x16xf32>, vector<16x32xf32>, vector<16x32xf32> -> vector<16x32xf32>
    %172 = vector.extract_strided_slice %140 {offsets = [0, 16], sizes = [16, 16], strides = [1, 1]} : vector<16x32xf32> to vector<16x16xf32>
    %173 = vector.extract_strided_slice %145 {offsets = [0, 16], sizes = [16, 16], strides = [1, 1]} : vector<16x32xf32> to vector<16x16xf32>
    %174 = vector.extract_strided_slice %146 {offsets = [0, 16], sizes = [16, 16], strides = [1, 1]} : vector<16x32xf32> to vector<16x16xf32>
    %175 = tpu.transpose %173, [1, 0] : vector<16x16xf32> -> vector<16x16xf32>
    %cst_81 = arith.constant dense<0.000000e+00> : vector<16x16xf32>
    %176 = tpu.matmul %172, %175, %cst_81 {dimension_numbers = #tpu.dot_dimension_numbers<[1], [0], [0], [1], [0, 0, 1, 1], [], []>} : vector<16x16xf32>, vector<16x16xf32>, vector<16x16xf32> -> vector<16x16xf32>
    %cst_82 = arith.constant 2.500000e-01 : f32
    %177 = vector.broadcast %cst_82 : f32 to vector<16x16xf32>
    %178 = arith.mulf %176, %177 : vector<16x16xf32>
    %179 = arith.addf %178, %4 : vector<16x16xf32>
    %cst_83 = arith.constant dense<0xFF800000> : vector<16xf32>
    %180 = vector.multi_reduction <maximumf>, %179, %cst_83 [1] : vector<16x16xf32> to vector<16xf32>
    %181 = vector.shape_cast %180 : vector<16xf32> to vector<16x1xf32>
    %182 = vector.broadcast %181 : vector<16x1xf32> to vector<16x16xf32>
    %183 = arith.subf %179, %182 : vector<16x16xf32>
    %184 = math.exp %183 : vector<16x16xf32>
    %cst_84 = arith.constant dense<0.000000e+00> : vector<16xf32>
    %185 = vector.multi_reduction <add>, %184, %cst_84 [1] : vector<16x16xf32> to vector<16xf32>
    %186 = vector.shape_cast %185 : vector<16xf32> to vector<16x1xf32>
    %187 = tpu.reciprocal %186 {approx = true} : vector<16x1xf32> -> vector<16x1xf32>
    %188 = vector.broadcast %187 : vector<16x1xf32> to vector<16x16xf32>
    %189 = arith.mulf %184, %188 : vector<16x16xf32>
    %cst_85 = arith.constant dense<0.000000e+00> : vector<16x16xf32>
    %190 = tpu.matmul %189, %174, %cst_85 {dimension_numbers = #tpu.dot_dimension_numbers<[1], [0], [0], [1], [0, 0, 1, 1], [], []>} : vector<16x16xf32>, vector<16x16xf32>, vector<16x16xf32> -> vector<16x16xf32>
    %191 = vector.extract_strided_slice %150 {offsets = [16, 0], sizes = [16, 32], strides = [1, 1]} : vector<32x32xf32> to vector<16x32xf32>
    %cst_86 = arith.constant dense<0.000000e+00> : vector<16x32xf32>
    %192 = tpu.matmul %190, %191, %cst_86 {dimension_numbers = #tpu.dot_dimension_numbers<[1], [0], [0], [1], [0, 0, 1, 1], [], []>} : vector<16x16xf32>, vector<16x32xf32>, vector<16x32xf32> -> vector<16x32xf32>
    %193 = arith.addf %171, %192 : vector<16x32xf32>
    %194 = arith.addf %114, %193 : vector<16x32xf32>
    %c1_87 = arith.constant 1 : index
    %c0_88 = arith.constant 0 : index
    %c0_89 = arith.constant 0 : index
    %195 = vector.load %arg6[%c1_87, %c0_88, %c0_89] : memref<2x1x32xf32, #tpu.memory_space<vmem>>, vector<1x1x32xf32>
    %196 = vector.shape_cast %195 : vector<1x1x32xf32> to vector<1x32xf32>
    %197 = arith.mulf %194, %194 : vector<16x32xf32>
    %cst_90 = arith.constant dense<0.000000e+00> : vector<16xf32>
    %198 = vector.multi_reduction <add>, %197, %cst_90 [1] : vector<16x32xf32> to vector<16xf32>
    %199 = vector.shape_cast %198 : vector<16xf32> to vector<16x1xf32>
    %cst_91 = arith.constant 3.200000e+01 : f32
    %200 = vector.broadcast %cst_91 : f32 to vector<16x1xf32>
    %201 = arith.divf %199, %200 : vector<16x1xf32>
    %cst_92 = arith.constant 9.99999974E-6 : f32
    %202 = vector.broadcast %cst_92 : f32 to vector<16x1xf32>
    %203 = arith.addf %201, %202 : vector<16x1xf32>
    %204 = math.rsqrt %203 : vector<16x1xf32>
    %205 = vector.broadcast %204 : vector<16x1xf32> to vector<16x32xf32>
    %206 = arith.mulf %194, %205 : vector<16x32xf32>
    %207 = vector.broadcast %196 : vector<1x32xf32> to vector<16x32xf32>
    %208 = arith.mulf %206, %207 : vector<16x32xf32>
    %c1_93 = arith.constant 1 : index
    %c0_94 = arith.constant 0 : index
    %c0_95 = arith.constant 0 : index
    %209 = vector.load %arg10[%c1_93, %c0_94, %c0_95] : memref<2x32x128xf32, #tpu.memory_space<vmem>>, vector<1x32x128xf32>
    %210 = vector.shape_cast %209 : vector<1x32x128xf32> to vector<32x128xf32>
    %cst_96 = arith.constant dense<0.000000e+00> : vector<16x128xf32>
    %211 = tpu.matmul %208, %210, %cst_96 {dimension_numbers = #tpu.dot_dimension_numbers<[1], [0], [0], [1], [0, 0, 1, 1], [], []>} : vector<16x32xf32>, vector<32x128xf32>, vector<16x128xf32> -> vector<16x128xf32>
    %212 = vector.extract_strided_slice %211 {offsets = [0, 0], sizes = [16, 64], strides = [1, 1]} : vector<16x128xf32> to vector<16x64xf32>
    %213 = vector.extract_strided_slice %211 {offsets = [0, 64], sizes = [16, 64], strides = [1, 1]} : vector<16x128xf32> to vector<16x64xf32>
    %214 = arith.negf %212 : vector<16x64xf32>
    %215 = math.exp %214 : vector<16x64xf32>
    %cst_97 = arith.constant 1.000000e+00 : f32
    %216 = vector.broadcast %cst_97 : f32 to vector<16x64xf32>
    %217 = arith.addf %216, %215 : vector<16x64xf32>
    %218 = arith.divf %216, %217 : vector<16x64xf32>
    %219 = arith.mulf %212, %218 : vector<16x64xf32>
    %220 = arith.mulf %219, %213 : vector<16x64xf32>
    %c1_98 = arith.constant 1 : index
    %c0_99 = arith.constant 0 : index
    %c0_100 = arith.constant 0 : index
    %221 = vector.load %arg11[%c1_98, %c0_99, %c0_100] : memref<2x64x32xf32, #tpu.memory_space<vmem>>, vector<1x64x32xf32>
    %222 = vector.shape_cast %221 : vector<1x64x32xf32> to vector<64x32xf32>
    %cst_101 = arith.constant dense<0.000000e+00> : vector<16x32xf32>
    %223 = tpu.matmul %220, %222, %cst_101 {dimension_numbers = #tpu.dot_dimension_numbers<[1], [0], [0], [1], [0, 0, 1, 1], [], []>} : vector<16x64xf32>, vector<64x32xf32>, vector<16x32xf32> -> vector<16x32xf32>
    %224 = arith.addf %194, %223 : vector<16x32xf32>
    %c0_102 = arith.constant 0 : index
    %c0_103 = arith.constant 0 : index
    %225 = vector.load %arg12[%c0_102, %c0_103] : memref<1x32xf32, #tpu.memory_space<vmem>>, vector<1x32xf32>
    %226 = arith.mulf %224, %224 : vector<16x32xf32>
    %cst_104 = arith.constant dense<0.000000e+00> : vector<16xf32>
    %227 = vector.multi_reduction <add>, %226, %cst_104 [1] : vector<16x32xf32> to vector<16xf32>
    %228 = vector.shape_cast %227 : vector<16xf32> to vector<16x1xf32>
    %cst_105 = arith.constant 3.200000e+01 : f32
    %229 = vector.broadcast %cst_105 : f32 to vector<16x1xf32>
    %230 = arith.divf %228, %229 : vector<16x1xf32>
    %cst_106 = arith.constant 9.99999974E-6 : f32
    %231 = vector.broadcast %cst_106 : f32 to vector<16x1xf32>
    %232 = arith.addf %230, %231 : vector<16x1xf32>
    %233 = math.rsqrt %232 : vector<16x1xf32>
    %234 = vector.broadcast %233 : vector<16x1xf32> to vector<16x32xf32>
    %235 = arith.mulf %224, %234 : vector<16x32xf32>
    %236 = vector.broadcast %225 : vector<1x32xf32> to vector<16x32xf32>
    %237 = arith.mulf %235, %236 : vector<16x32xf32>
    %c0_107 = arith.constant 0 : index
    %c128 = arith.constant 128 : index
    %238 = vector.load %arg13[%c0_107, %c128] : memref<16x160xf32, #tpu.memory_space<vmem>>, vector<16x32xf32>
    tpu.vector_store %arg13[%c0_107, %c128], %237 {strides = array<i32>} : memref<16x160xf32, #tpu.memory_space<vmem>>, vector<16x32xf32>,
    return
  }
}

</mosaic_0001>

<bundles_post_ra>
// kernel: tpu_custom_call.1
= control target key start
LH: loop header
LB: loop body
LE: loop exit
PB: predicated region body
PF: predicated region fallthrough
CT: control target
= control target key end

     0   :  { %18 = vsyncpa [#allocation3], 0  ;;  %s3855_s0 = inlined_call_operand.hbm [shape: f32[16,32], index: 0, kind: input, shape index: {}]   ;;  %s3856_s1 = inlined_call_operand.hbm [shape: f32[16,32], index: 1, kind: input, shape index: {}]   ;;  %s3857_s2 = inlined_call_operand.hbm [shape: f32[16,32], index: 2, kind: input, shape index: {}]   ;;  %s3858_s3 = inlined_call_operand.hbm [shape: f32[32,32], index: 3, kind: input, shape index: {}]   ;;  %s3859_s4 = inlined_call_operand.hbm [shape: f32[16,16], index: 4, kind: input, shape index: {}]   ;;  %s3860_s5 = inlined_call_operand.vmem [shape: f32[2,1,32], index: 5, kind: input, shape index: {}]   ;;  %s3861_s6 = inlined_call_operand.vmem [shape: f32[2,1,32], index: 6, kind: input, shape index: {}]   ;;  %s3862_s7 = inlined_call_operand.vmem [shape: f32[2,32,96], index: 7, kind: input, shape index: {}]   ;;  %s3863_s8 = inlined_call_operand.vmem [shape: f32[2,1,96], index: 8, kind: input, shape index: {}]   ;;  %s3864_s9 = inlined_call_operand.vmem [shape: f32[2,32,32], index: 9, kind: input, shape index: {}]   ;;  %s3865_s10 = inlined_call_operand.vmem [shape: f32[2,32,128], index: 10, kind: input, shape index: {}]   ;;  %s3866_s11 = inlined_call_operand.vmem [shape: f32[2,64,32], index: 11, kind: input, shape index: {}]   ;;  %s3867_s12 = inlined_call_operand.vmem [shape: f32[1,32], index: 12, kind: input, shape index: {}]   ;;  %s3868_s13 = inlined_call_operand.hbm [shape: f32[16,160], index: 13, kind: output, shape index: {}]  }
   0x1   :  { %19 = vsyncpa [#allocation6], 0 }
   0x2   :  { %20 = vsyncpa [#allocation9], 0 }
   0x3   :  { %21 = vsyncpa [#allocation4], 0  ;;  %s3248_s25 = smov [#allocation5]   ;;  %s3249_s27 = smov [#allocation8]  }
   0x4   :  { %s39_s26 = sshll.u32 %s3248_s25, 4  ;;  %s63_s28 = sshll.u32 %s3249_s27, 4  ;;  %s40_s26 = int_to_ptr.vmem [resolvable:$true] %s39_s26  ;;  %s3334_s28 = int_to_ptr.vmem [resolvable:$true] %s63_s28 }
   0x5   :  { %s3108_s14 = scalar_lea.hbm %s3856_s1, 256 }
   0x6   :  { %p3109_p0 = scmp.ne.s32.totalorder %s3856_s1, %s3108_s14  ;;  %p3112_p1 = scmp.lt.u32.totalorder %s3108_s14, %s3856_s1 }
   0x8   :  { %p3114_p2 = pnand %p3112_p1, %p3109_p0 }
   0xa   :  { %3117 = shalt.err (!%p3114_p2)
}
   0xb   :  { %s3118_s19 = scalar_lea.vmem %s40_s26, 256  ;;  %p3123_p4 = scmp.lt.s32.totalorder %s40_s26, %s40_s26 }
   0xc   :  { %p3119_p3 = scmp.ne.s32.totalorder %s40_s26, %s3118_s19  ;;  %p3124_p5 = scmp.lt.s32.totalorder %s3118_s19, %s3118_s19 }
   0xe   :  { %p3125_p6 = por %p3124_p5, %p3123_p4 }
  0x10   :  { %p3126_p7 = pnand %p3125_p6, %p3119_p3 }
  0x12   :  { %3129 = shalt.err (!%p3126_p7)
}
  0x13   :  { %s3250_s20 = smov 128   ;;  %s3251_s21 = smov 8  }
  0x14   :  { %45 = dma.hbm_to_vmem [thread:$0]  %s3856_s1, 256, %s40_s26, [#allocation6], %s3250_s20, %s3250_s20, %s3251_s21  }
  0x15   :  { %s3130_s27 = scalar_lea.hbm %s3858_s3, 512 }
  0x16   :  { %p3131_p8 = scmp.ne.s32.totalorder %s3858_s3, %s3130_s27  ;;  %p3134_p9 = scmp.lt.u32.totalorder %s3130_s27, %s3858_s3 }
  0x18   :  { %p3136_p10 = pnand %p3134_p9, %p3131_p8 }
  0x1a   :  { %3139 = shalt.err (!%p3136_p10)
}
  0x1b   :  { %s3140_s16 = scalar_lea.vmem %s3334_s28, 512  ;;  %p3145_p12 = scmp.lt.s32.totalorder %s3334_s28, %s3334_s28 }
  0x1c   :  { %p3141_p11 = scmp.ne.s32.totalorder %s3334_s28, %s3140_s16  ;;  %p3146_p13 = scmp.lt.s32.totalorder %s3140_s16, %s3140_s16 }
  0x1e   :  { %p3147_p0 = por %p3146_p13, %p3145_p12 }
  0x20   :  { %p3148_p1 = pnand %p3147_p0, %p3141_p11 }
  0x22   :  { %3151 = shalt.err (!%p3148_p1)
}
  0x23   :  { %69 = dma.hbm_to_vmem [thread:$0]  %s3858_s3, 512, %s3334_s28, [#allocation9], %s3250_s20, %s3250_s20, %s3251_s21  }
  0x24   :  { %s3252_s17 = smov [#allocation2]   ;;  %s3253_s19 = smov [#allocation7]  }
  0x25   :  { %s27_s18 = sshll.u32 %s3252_s17, 4  ;;  %s51_s22 = sshll.u32 %s3253_s19, 4  ;;  %s28_s18 = int_to_ptr.vmem [resolvable:$true] %s27_s18  ;;  %s3371_s22 = int_to_ptr.vmem [resolvable:$true] %s51_s22 }
  0x26   :  { %s3152_s25 = scalar_lea.hbm %s3855_s0, 256 }
  0x27   :  { %p3153_p2 = scmp.ne.s32.totalorder %s3855_s0, %s3152_s25  ;;  %p3156_p3 = scmp.lt.u32.totalorder %s3152_s25, %s3855_s0 }
  0x29   :  { %p3158_p4 = pnand %p3156_p3, %p3153_p2 }
  0x2b   :  { %3161 = shalt.err (!%p3158_p4)
}
  0x2c   :  { %s3162_s3 = scalar_lea.vmem %s28_s18, 256  ;;  %p3167_p6 = scmp.lt.s32.totalorder %s28_s18, %s28_s18 }
  0x2d   :  { %p3163_p5 = scmp.ne.s32.totalorder %s28_s18, %s3162_s3  ;;  %p3168_p7 = scmp.lt.s32.totalorder %s3162_s3, %s3162_s3 }
  0x2f   :  { %p3169_p8 = por %p3168_p7, %p3167_p6 }
  0x31   :  { %p3170_p9 = pnand %p3169_p8, %p3163_p5 }
  0x33   :  { %3173 = shalt.err (!%p3170_p9)
}
  0x34   :  { %33 = dma.hbm_to_vmem [thread:$0]  %s3855_s0, 256, %s28_s18, [#allocation3], %s3250_s20, %s3250_s20, %s3251_s21  }
  0x35   :  { %s3174_s26 = scalar_lea.hbm %s3857_s2, 256 }
  0x36   :  { %p3175_p10 = scmp.ne.s32.totalorder %s3857_s2, %s3174_s26  ;;  %p3178_p11 = scmp.lt.u32.totalorder %s3174_s26, %s3857_s2 }
  0x38   :  { %p3180_p12 = pnand %p3178_p11, %p3175_p10 }
  0x3a   :  { %3183 = shalt.err (!%p3180_p12)
}
  0x3b   :  { %s3184_s25 = scalar_lea.vmem %s3371_s22, 256  ;;  %p3189_p0 = scmp.lt.s32.totalorder %s3371_s22, %s3371_s22 }
  0x3c   :  { %p3185_p13 = scmp.ne.s32.totalorder %s3371_s22, %s3184_s25  ;;  %p3190_p1 = scmp.lt.s32.totalorder %s3184_s25, %s3184_s25 }
  0x3e   :  { %p3191_p2 = por %p3190_p1, %p3189_p0 }
  0x40   :  { %p3192_p3 = pnand %p3191_p2, %p3185_p13 }
  0x42   :  { %3195 = shalt.err (!%p3192_p3)
}
  0x43   :  { %57 = dma.hbm_to_vmem [thread:$0]  %s3857_s2, 256, %s3371_s22, [#allocation6], %s3250_s20, %s3250_s20, %s3251_s21  }
  0x44   :  { %s3254_s27 = smov [#allocation10]   ;;  %s3196_s3 = scalar_lea.hbm %s3859_s4, 256 }
  0x45   :  { %s75_s29 = sshll.u32 %s3254_s27, 4  ;;  %p3197_p4 = scmp.ne.s32.totalorder %s3859_s4, %s3196_s3  ;;  %s76_s29 = int_to_ptr.vmem [resolvable:$true] %s75_s29 }
  0x46   :  { %p3200_p5 = scmp.lt.u32.totalorder %s3196_s3, %s3859_s4 }
  0x48   :  { %p3202_p6 = pnand %p3200_p5, %p3197_p4 }
  0x4a   :  { %3205 = shalt.err (!%p3202_p6)
}
  0x4b   :  { %s3206_s26 = scalar_lea.vmem %s76_s29, 256  ;;  %p3211_p8 = scmp.lt.s32.totalorder %s76_s29, %s76_s29 }
  0x4c   :  { %p3207_p7 = scmp.ne.s32.totalorder %s76_s29, %s3206_s26  ;;  %p3212_p9 = scmp.lt.s32.totalorder %s3206_s26, %s3206_s26 }
  0x4e   :  { %p3213_p10 = por %p3212_p9, %p3211_p8 }
  0x50   :  { %p3214_p11 = pnand %p3213_p10, %p3207_p7 }
  0x52   :  { %3217 = shalt.err (!%p3214_p11)
}
  0x53   :  { %81 = dma.hbm_to_vmem [thread:$0]  %s3859_s4, 256, %s76_s29, [#allocation9], %s3250_s20, %s3250_s20, %s3251_s21  }
  0x54   :  { %3240 = dma.done.wait [#allocation3], 256  }
  0x55   :  { %3241 = vsyncadd [#allocation3], 4294967040 }
  0x56   :  { %3242 = dma.done.wait [#allocation6], 512  }
  0x57   :  { %3243 = vsyncadd [#allocation6], 4294966784 }
  0x58   :  { %3244 = dma.done.wait [#allocation9], 768  }
  0x59   :  { %3245 = vsyncadd [#allocation9], 4294966528  ;;  %v3423_v0 = vld [vmem:[#allocation2] sm:$0xff]  ;;  %vm128_vm0 = vcmask 261120   ;;  %v3425_v1 = vld [vmem:[#allocation2 + $0x8] sm:$0xff]  ;;  %s3255_s0 = smov 32  }
  0x5a   :  { %v126_v2 = vmul.f32 %v3423_v0, %v3423_v0  ;;  %v127_v3 = vmul.f32 %v3425_v1, %v3425_v1  ;;  %v152_v6 = vld [vmem:[%s3862_s7] sm:$0xff]  ;;  %v153_v7 = vld [vmem:[%s3862_s7 + $0x8] sm:$0xff]  ;;  %v154_v8 = vld [vmem:[%s3862_s7 + $0x10] sm:$0xff]  ;;  %s3256_s14 = smov 96   ;;  %vm455_vm1 = vcmask 130048   ;;  %s3257_s3 = smov 112  }
  0x5b   :  { %v2833_v9 = vpack.c.bf16 %v153_v7, %v152_v6  ;;  %v155_v10 = vld [vmem:[%s3862_s7 + $0x18] sm:$0xff]  ;;  %v3445_v12 = vld [vmem:[#allocation5] sm:$0xff]  ;;  %v2421_v23 = vld [vmem:[%s3860_s5] ss:$0 sm:$0xff]  ;;  %s3258_s28 = smov 80   ;;  %vm448_vm2 = vcmask 523520  }
  0x5c   :  { %v129_v4 = vsel %vm128_vm0, %v126_v2, 0.0  ;;  %v132_v5 = vsel %vm128_vm0, %v127_v3, 0.0  ;;  %v2837_v11 = vpack.c.bf16 %v155_v10, %v154_v8  ;;  %v119_v13 = vld [vmem:[#allocation8] sm:$0xff]  ;;  %v120_v14 = vld [vmem:[#allocation8 + $0x8] sm:$0xff]  ;;  %v121_v29 = vld [vmem:[#allocation8 + $0x10] sm:$0xff]  ;;  %s3259_s15 = smov 64  }
  0x5d   :  { %130 = vadd.xlane.f32.xlu0 %v129_v4  ;;  %2834 = vmatprep.subr.bf16.mxu1 %v2833_v9  ;;  %v3449_v15 = vpack.c.bf16 %v120_v14, %v119_v13  ;;  %v122_v30 = vld [vmem:[#allocation8 + $0x18] sm:$0xff]  ;;  %v2422_v32 = vld [vmem:[%s3863_s8] ss:$0 sm:$0xff]  ;;  %v3483_v37 = vld [vmem:[#allocation5 + $0x8] sm:$0xff]  ;;  %s3260_s16 = smov 48   ;;  %vm1164_vm4 = vcmask 523264  }
  0x5e   :  { %2836 = vmatpush3.bf16.msra.mxu1 %v2833_v9  ;;  %v3462_v31 = vpack.c.bf16 %v122_v30, %v121_v29  ;;  %v3489_v40 = vld [vmem:[#allocation7] sm:$0xff]  ;;  %v3498_v49 = vld [vmem:[#allocation7 + $0x8] sm:$0xff]  ;;  %vm3520_vm3 = vmpackc.low %vm455_vm1, %vm455_vm1  ;;  %vm1560_vm5 = vcmask 785920   ;;  %vm1569_vm6 = vcmask 1048320  }
  0x5f   :  { %2838 = vmatprep.subr.bf16.mxu1 %v2837_v11  ;;  %2850 = vmatprep.subr.bf16.mxu0 %v3449_v15  ;;  %v3536_v13 = vld [vmem:[#allocation10 + $0x8] sm:$0xff] }
  0x60   :  { %2852 = vmatpush3.bf16.msra.mxu0 %v3449_v15 }
  0x61   :  { %133 = vadd.xlane.f32.xlu0 %v132_v5  ;;  %2854 = vmatprep.subr.bf16.mxu0 %v3462_v31 }
  0x62   :  { %2840 = vmatpush3.bf16.msra.mxu1 %v2837_v11 }
  0x63   :  { %2842 = vmatprep.subr.bf16.mxu1 %v3449_v15 }
  0x64   :  { %2856 = vmatpush3.bf16.msra.mxu0 %v3462_v31 }
  0x77   :  { %333 = vrot.lane.b32.xlu0 %v3445_v12, %s3255_s0 }
  0xea   :  { %v131_v16 = vpop.xlane.xlu0 %130 }
  0xeb   :  { %v136_v17 = vmul.f32 0.03125, %v131_v16 }
  0xed   :  { %v138_v18 = vadd.f32 1e-05, %v136_v17  ;;  %v3538_v17 = vld [vmem:[#allocation10] sm:$0xff] }
  0xee   :  { %v134_v19 = vpop.xlane.xlu0 %133 }
  0xef   :  { %3040 = vrsqrt.f32 %v138_v18  ;;  %v137_v20 = vmul.f32 0.03125, %v134_v19 }
  0xf1   :  { %v139_v21 = vadd.f32 1e-05, %v137_v20 }
  0xf2   :  { %v3502_v51 = vpop.permute.xlu0 %333 }
  0xf3   :  { %3042 = vrsqrt.f32 %v139_v21 }
  0xf9   :  { %v3041_v22 = vpop.eup %3040 }
  0xfa   :  { %v142_v24 = vmul.f32 %v3041_v22, %v3423_v0 }
  0xfc   :  { %v150_v25 = vmul.f32 %v2421_v23, %v142_v24 }
  0xfd   :  { %v3043_v26 = vpop.eup %3042 }
  0xfe   :  { %v143_v27 = vmul.f32 %v3043_v26, %v3425_v1  ;;  %2631 = vmatprep.mubr.msk.f32.mxu1 %vm128_vm0, %v150_v25 }
 0x100   :  { %v151_v28 = vmul.f32 %v2421_v23, %v143_v27 }
 0x102   :  { %2632 = vmatmul.mubr.msk.f32.vlgmr.msra.gmra.mrb[0].mxu1 %vm128_vm0, %v151_v28 }
 0x103   :  { %2844 = vmatpush3.bf16.msra.mxu1 %v3449_v15 }
 0x104   :  { %2846 = vmatprep.subr.bf16.mxu1 %v3462_v31 }
 0x107   :  { %2848 = vmatpush3.bf16.msra.mxu1 %v3462_v31 }
 0x1d5   :  { %v2633_v33 = vpop.f32.mrb[0].mxu1 }
 0x1d6   :  { %v235_v34 = vpop.f32.mrb[1].mxu1  ;;  %v3473_v36 = vadd.f32 %v2633_v33, %v2422_v32 }
 0x1d7   :  { %v3471_v35 = vadd.f32 %v2422_v32, %v235_v34 }
 0x1d8   :  { %v245_v61 = vmul.f32 %v3473_v36, %v3483_v37 }
 0x1d9   :  { %341 = vrot.lane.b32.xlu1 %v3471_v35, %s3256_s14  ;;  %2642 = vmatprep.mubr.msk.f32.mxu1 %vm128_vm0, %v3471_v35  ;;  %v244_v43 = vmul.f32 %v3471_v35, %v3445_v12  ;;  %v339_v53 = vmul.f32 %v3502_v51, %v3471_v35 }
 0x1da   :  { %2643 = vmatmul.mubr.msk.f32.vlgmr.msra.gmra.mrb[2].mxu1 %vm128_vm0, %v3473_v36 }
 0x1dd   :  { %343 = vrot.lane.b32.xlu1 %v3473_v36, %s3256_s14 }
 0x1e1   :  { %335 = vrot.lane.b32.xlu1 %v3483_v37, %s3255_s0 }
 0x24b   :  { %v342_v38 = vpop.permute.xlu1 %341 }
 0x24c   :  { %2653 = vmatprep.mubr.msk.f32.mxu0 %vm128_vm0, %v342_v38 }
 0x24f   :  { %v344_v39 = vpop.permute.xlu1 %343 }
 0x250   :  { %2654 = vmatmul.mubr.msk.f32.vlgmr.msra.gmra.mrb[0].mxu0 %vm128_vm0, %v344_v39 }
 0x253   :  { %v3504_v52 = vpop.permute.xlu1 %335 }
 0x254   :  { %v340_v56 = vmul.f32 %v3504_v52, %v3473_v36 }
 0x2ad   :  { %v2644_v41 = vpop.f32.mrb[2].mxu1 }
 0x2ae   :  { %v318_v42 = vpop.f32.mrb[3].mxu1  ;;  %v328_v59 = vmul.f32 %v2644_v41, %v3498_v49 }
 0x2af   :  { %v327_v44 = vmul.f32 %v318_v42, %v3489_v40 }
 0x2b0   :  { %v330_v62 = vadd.f32 %v328_v59, %v245_v61  ;;  %v3010_v59 = vpack.i.bf16 %v3473_v36, %v3471_v35 }
 0x2b1   :  { %v329_v45 = vadd.f32 %v327_v44, %v244_v43 }
 0x2b3   :  { %654 = vrot.lane.b32.xlu0 %v329_v45, %s3257_s3  ;;  %2660 = vmatprep.mubr.msk.f32.mxu1 %vm455_vm1, %v329_v45 }
 0x323   :  { %v2655_v46 = vpop.f32.mrb[0].mxu0 }
 0x324   :  { %v415_v47 = vpop.f32.mrb[1].mxu0  ;;  %v425_v50 = vmul.f32 %v2655_v46, %v3498_v49 }
 0x325   :  { %v424_v48 = vmul.f32 %v415_v47, %v3489_v40  ;;  %v655_v9 = vpop.permute.xlu0 %654 }
 0x327   :  { %428 = vrot.lane.b32.xlu1 %v424_v48, %s3255_s0 }
 0x32b   :  { %430 = vrot.lane.b32.xlu1 %v425_v50, %s3255_s0 }
 0x399   :  { %v429_v54 = vpop.permute.xlu1 %428 }
 0x39a   :  { %v434_v55 = vadd.f32 %v429_v54, %v339_v53 }
 0x39c   :  { %438 = vrot.lane.b32.xlu1 %v434_v55, %s3256_s14 }
 0x39d   :  { %v431_v57 = vpop.permute.xlu1 %430 }
 0x39e   :  { %v435_v58 = vadd.f32 %v431_v57, %v340_v56 }
 0x3a0   :  { %440 = vrot.lane.b32.xlu1 %v435_v58, %s3256_s14  ;;  %v3005_v60 = vpack.i.bf16 %v435_v58, %v434_v55 }
 0x3a4   :  { %3006 = vrot.lane.b32.xlu1 %v3005_v60, %s3258_s28 }
 0x3a8   :  { %656 = vrot.lane.b32.xlu1 %v330_v62, %s3257_s3 }
 0x40e   :  { %v439_v63 = vpop.permute.xlu1 %438 }
 0x40f   :  { %444 = vst.msk [vmem:[#allocation11] sm:$0xff] %vm128_vm0, %v439_v63 }
 0x410   :  { %449 = vst.msk [vmem:[#allocation11] sm:$0xff] %vm448_vm2, %v342_v38 }
 0x412   :  { %v441_v2 = vpop.permute.xlu1 %440 }
 0x413   :  { %445 = vst.msk [vmem:[#allocation11 + $0x10] sm:$0xff] %vm128_vm0, %v441_v2  ;;  %v2857_v4 = vpack.c.bf16 %v441_v2, %v439_v63 }
 0x414   :  { %450 = vst.msk [vmem:[#allocation11 + $0x10] sm:$0xff] %vm448_vm2, %v344_v39 }
 0x415   :  { %2859 = vmatprep.subr.msk.bf16.mxu1 %vm3520_vm3, %v2857_v4 }
 0x416   :  { %2862 = vmatpush3.bf16.xpose.msk.msra.mxu1 %vm3520_vm3, %v2857_v4  ;;  %v3007_v5 = vpop.permute.xlu1 %3006 }
 0x417   :  { %v3009_v6 = vunpack.i.h.bf16 %v3007_v5  ;;  %v3008_v7 = vunpack.i.l.bf16 %v3007_v5 }
 0x419   :  { %v2867_v8 = vpack.c.bf16 %v3009_v6, %v3008_v7 }
 0x41a   :  { %v657_v10 = vpop.permute.xlu1 %656 }
 0x41b   :  { %2869 = vmatprep.subr.msk.bf16.mxu1 %vm3520_vm3, %v2867_v8 }
 0x41d   :  { %2661 = vmatmul.mubr.msk.f32.vlgmr.msra.gmra.mrb[4].mxu1 %vm455_vm1, %v330_v62 }
 0x41e   :  { %2872 = vmatpush3.bf16.xpose.msk.msra.mxu1 %vm3520_vm3, %v2867_v8  ;;  %2674 = vmatprep.mubr.msk.f32.mxu1 %vm455_vm1, %v655_v9 }
 0x425   :  { %2675 = vmatmul.mubr.msk.f32.vlgmr.msra.gmra.mrb[6].mxu1 %vm455_vm1, %v657_v10 }
 0x4f0   :  { %v2662_v11 = vpop.f32.mrb[4].mxu1 }
 0x4f1   :  { %v542_v14 = vmul.f32 0.25, %v2662_v11  ;;  %v532_v16 = vpop.f32.mrb[5].mxu1 }
 0x4f2   :  { %v541_v18 = vmul.f32 0.25, %v532_v16 }
 0x4f3   :  { %v544_v19 = vadd.f32 %v542_v14, %v3536_v13 }
 0x4f4   :  { %v543_v20 = vadd.f32 %v541_v18, %v3538_v17 }
 0x4f5   :  { %v548_v21 = vsel %vm455_vm1, %v544_v19, -inf }
 0x4f6   :  { %549 = vmax.xlane.f32.xlu1 %v548_v21  ;;  %v545_v22 = vsel %vm455_vm1, %v543_v20, -inf  ;;  %v453_v21 = vld [vmem:[%s3864_s9 + $0x10] sm:$0xff] }
 0x4f7   :  { %546 = vmax.xlane.f32.xlu0 %v545_v22  ;;  %v454_v22 = vld [vmem:[%s3864_s9 + $0x18] sm:$0xff] }
 0x4f8   :  { %v2676_v23 = vpop.f32.mrb[6].mxu1 }
 0x4f9   :  { %v736_v24 = vpop.f32.mrb[7].mxu1  ;;  %v746_v25 = vmul.f32 0.25, %v2676_v23  ;;  %v2877_v23 = vpack.c.bf16 %v454_v22, %v453_v21 }
 0x4fa   :  { %v745_v26 = vmul.f32 0.25, %v736_v24  ;;  %v451_v24 = vld [vmem:[%s3864_s9] sm:$0xff] }
 0x4fb   :  { %v748_v29 = vadd.f32 %v746_v25, %v3536_v13  ;;  %v452_v25 = vld [vmem:[%s3864_s9 + $0x8] sm:$0xff] }
 0x4fc   :  { %v747_v27 = vadd.f32 %v745_v26, %v3538_v17  ;;  %v2881_v26 = vpack.c.bf16 %v452_v25, %v451_v24 }
 0x4fd   :  { %v752_v30 = vsel %vm455_vm1, %v748_v29, -inf }
 0x4fe   :  { %v749_v28 = vsel %vm455_vm1, %v747_v27, -inf }
 0x4ff   :  { %750 = vmax.xlane.f32.xlu0 %v749_v28 }
 0x503   :  { %753 = vmax.xlane.f32.xlu0 %v752_v30 }
 0x583   :  { %v550_v32 = vpop.xlane.xlu1 %549 }
 0x584   :  { %v552_v33 = vsub.f32 %v544_v19, %v550_v32  ;;  %v547_v34 = vpop.xlane.xlu0 %546 }
 0x585   :  { %v551_v38 = vsub.f32 %v543_v20, %v547_v34 }
 0x586   :  { %v555_v39 = vmul.f32 1.442695, %v552_v33 }
 0x587   :  { %v553_v41 = vmul.f32 1.442695, %v551_v38 }
 0x588   :  { %3044 = vpow2.f32 %v555_v39 }
 0x589   :  { %3046 = vpow2.f32 %v553_v41 }
 0x58c   :  { %v751_v42 = vpop.xlane.xlu0 %750 }
 0x58d   :  { %v755_v43 = vsub.f32 %v747_v27, %v751_v42 }
 0x58f   :  { %v757_v44 = vmul.f32 1.442695, %v755_v43 }
 0x590   :  { %v754_v45 = vpop.xlane.xlu0 %753 }
 0x591   :  { %3048 = vpow2.f32 %v757_v44  ;;  %v756_v46 = vsub.f32 %v748_v29, %v754_v45  ;;  %v1049_v44 = vld [vmem:[%s3865_s10 + $0x10] sm:$0xff] }
 0x592   :  { %v3045_v47 = vpop.eup %3044 }
 0x593   :  { %v3047_v48 = vpop.eup %3046  ;;  %v759_v50 = vmul.f32 1.442695, %v756_v46  ;;  %v560_v53 = vsel %vm455_vm1, %v3045_v47, 0.0  ;;  %v1050_v46 = vld [vmem:[%s3865_s10 + $0x18] sm:$0xff] }
 0x594   :  { %561 = vadd.xlane.f32.xlu0 %v560_v53  ;;  %v557_v54 = vsel %vm455_vm1, %v3047_v48, 0.0 }
 0x595   :  { %3050 = vpow2.f32 %v759_v50  ;;  %558 = vadd.xlane.f32.xlu1 %v557_v54 }
 0x59b   :  { %v3049_v55 = vpop.eup %3048 }
 0x59c   :  { %v761_v56 = vsel %vm455_vm1, %v3049_v55, 0.0 }
 0x59d   :  { %762 = vadd.xlane.f32.xlu1 %v761_v56 }
 0x59f   :  { %v3051_v57 = vpop.eup %3050 }
 0x5a0   :  { %v764_v58 = vsel %vm455_vm1, %v3051_v57, 0.0 }
 0x5a1   :  { %765 = vadd.xlane.f32.xlu0 %v764_v58 }
 0x5ae   :  { %3011 = vrot.lane.b32.xlu1 %v3010_v59, %s3259_s15 }
 0x5b7   :  { %3016 = vrot.lane.b32.xlu0 %v3010_v59, %s3260_s16  ;;  %v2445_v59 = vld [vmem:[%s3861_s6] ss:$0 sm:$0xff] }
 0x621   :  { %v562_v61 = vpop.xlane.xlu0 %561 }
 0x622   :  { %v559_v60 = vpop.xlane.xlu1 %558 }
 0x623   :  { %3052 = vrcp.f32 %v559_v60 }
 0x624   :  { %3054 = vrcp.f32 %v562_v61 }
 0x62a   :  { %v763_v62 = vpop.xlane.xlu1 %762 }
 0x62b   :  { %3056 = vrcp.f32 %v763_v62 }
 0x62d   :  { %v3053_v63 = vpop.eup %3052 }
 0x62e   :  { %v3012_v2 = vpop.permute.xlu1 %3011  ;;  %v766_v4 = vpop.xlane.xlu0 %765  ;;  %v565_v5 = vmul.f32 %v3053_v63, %v3047_v48 }
 0x62f   :  { %v3014_v6 = vunpack.i.h.bf16 %v3012_v2  ;;  %v3013_v7 = vunpack.i.l.bf16 %v3012_v2  ;;  %3058 = vrcp.f32 %v766_v4  ;;  %v3055_v36 = vpop.eup %3054  ;;  %v1156_v2 = vld [vmem:[%s3866_s11] sm:$0xff]  ;;  %v1157_v4 = vld [vmem:[%s3866_s11 + $0x8] sm:$0xff] }
 0x630   :  { %2667 = vmatprep.mubr.msk.f32.mxu0 %vm455_vm1, %v565_v5  ;;  %v566_v14 = vmul.f32 %v3055_v36, %v3045_v47  ;;  %v2889_v47 = vpack.c.bf16 %v1050_v46, %v1049_v44  ;;  %v1158_v5 = vld [vmem:[%s3866_s11 + $0x10] sm:$0xff]  ;;  %v1160_v36 = vld [vmem:[%s3866_s11 + $0x20] sm:$0xff] }
 0x631   :  { %v2863_v35 = vpack.c.bf16 %v3014_v6, %v3013_v7  ;;  %v2893_v6 = vpack.c.bf16 %v1157_v4, %v1156_v2  ;;  %v1159_v7 = vld [vmem:[%s3866_s11 + $0x18] sm:$0xff]  ;;  %v2456_v46 = vld [vmem:[%s3862_s7 + $0x30] sm:$0xff] }
 0x632   :  { %v3017_v8 = vpop.permute.xlu0 %3016 }
 0x633   :  { %v3019_v9 = vunpack.i.h.bf16 %v3017_v8  ;;  %v3018_v10 = vunpack.i.l.bf16 %v3017_v8  ;;  %2864 = vmatprep.subr.bf16.mxu0 %v2863_v35  ;;  %v1161_v8 = vld [vmem:[%s3866_s11 + $0x28] sm:$0xff] }
 0x634   :  { %2866 = vmatpush3.bf16.msra.mxu0 %v2863_v35  ;;  %v2897_v35 = vpack.c.bf16 %v1159_v7, %v1158_v5  ;;  %v2459_v5 = vld [vmem:[%s3863_s8 + $0x1] ss:$0 sm:$0xff] }
 0x635   :  { %v3057_v11 = vpop.eup %3056  ;;  %v2873_v16 = vpack.c.bf16 %v3019_v9, %v3018_v10  ;;  %v2901_v9 = vpack.c.bf16 %v1161_v8, %v1160_v36  ;;  %v1162_v10 = vld [vmem:[%s3866_s11 + $0x30] sm:$0xff] }
 0x636   :  { %v769_v18 = vmul.f32 %v3057_v11, %v3049_v55  ;;  %v1163_v11 = vld [vmem:[%s3866_s11 + $0x38] sm:$0xff] }
 0x637   :  { %2668 = vmatmul.mubr.msk.f32.vlgmr.msra.gmra.mrb[2].mxu0 %vm455_vm1, %v566_v14  ;;  %2874 = vmatprep.subr.bf16.mxu0 %v2873_v16  ;;  %v2905_v14 = vpack.c.bf16 %v1163_v11, %v1162_v10 }
 0x638   :  { %2876 = vmatpush3.bf16.msra.mxu0 %v2873_v16  ;;  %2681 = vmatprep.mubr.msk.f32.mxu0 %vm455_vm1, %v769_v18 }
 0x639   :  { %v3059_v19 = vpop.eup %3058  ;;  %2878 = vmatprep.subr.bf16.mxu0 %v2877_v23 }
 0x63a   :  { %v770_v20 = vmul.f32 %v3059_v19, %v3051_v57 }
 0x63c   :  { %2682 = vmatmul.mubr.msk.f32.vlgmr.msra.gmra.mrb[4].mxu0 %vm455_vm1, %v770_v20 }
 0x63d   :  { %2880 = vmatpush3.bf16.msra.mxu0 %v2877_v23 }
 0x63e   :  { %2882 = vmatprep.subr.bf16.mxu0 %v2881_v26 }
 0x70a   :  { %v2669_v27 = vpop.f32.mrb[2].mxu0 }
 0x70b   :  { %v645_v28 = vpop.f32.mrb[3].mxu0 }
 0x70f   :  { %v2683_v29 = vpop.f32.mrb[4].mxu0 }
 0x710   :  { %v849_v30 = vpop.f32.mrb[5].mxu0 }
 0x711   :  { %2688 = vmatprep.mubr.msk.f32.mxu0 %vm455_vm1, %v849_v30 }
 0x712   :  { %2689 = vmatmul.mubr.msk.f32.vlgmr.msra.gmra.mrb[6].mxu0 %vm455_vm1, %v2683_v29 }
 0x713   :  { %2884 = vmatpush3.bf16.msra.mxu0 %v2881_v26  ;;  %2695 = vmatprep.mubr.msk.f32.mxu0 %vm455_vm1, %v645_v28 }
 0x714   :  { %2894 = vmatprep.subr.bf16.mxu0 %v2893_v6 }
 0x71a   :  { %2696 = vmatmul.mubr.msk.f32.vlgmr.msra.gmra.mrb[6].mxu0 %vm455_vm1, %v2669_v27 }
 0x71b   :  { %2896 = vmatpush3.bf16.msra.mxu0 %v2893_v6 }
 0x71c   :  { %2898 = vmatprep.subr.bf16.mxu0 %v2897_v35 }
 0x71f   :  { %2900 = vmatpush3.bf16.msra.mxu0 %v2897_v35 }
 0x720   :  { %2902 = vmatprep.subr.bf16.mxu0 %v2901_v9 }
 0x723   :  { %2904 = vmatpush3.bf16.msra.mxu0 %v2901_v9 }
 0x724   :  { %2906 = vmatprep.subr.bf16.mxu0 %v2905_v14 }
 0x727   :  { %2908 = vmatpush3.bf16.msra.mxu0 %v2905_v14 }
 0x728   :  { %2926 = vmatprep.subr.bf16.mxu0 %v3449_v15 }
 0x7ed   :  { %v2697_v32 = vpop.f32.mrb[6].mxu0 }
 0x7ee   :  { %v3577_v33 = vadd.f32 %v2697_v32, %v3425_v1  ;;  %v1011_v34 = vpop.f32.mrb[7].mxu0  ;;  %v1047_v1 = vld [vmem:[%s3865_s10] sm:$0xff] }
 0x7ef   :  { %v3580_v38 = vadd.f32 %v1011_v34, %v3423_v0  ;;  %v1048_v0 = vld [vmem:[%s3865_s10 + $0x8] sm:$0xff] }
 0x7f0   :  { %v1024_v39 = vmul.f32 %v3577_v33, %v3577_v33  ;;  %v2885_v45 = vpack.c.bf16 %v1048_v0, %v1047_v1 }
 0x7f1   :  { %v1023_v41 = vmul.f32 %v3580_v38, %v3580_v38 }
 0x7f2   :  { %v1028_v42 = vsel %vm128_vm0, %v1024_v39, 0.0  ;;  %2886 = vmatprep.subr.bf16.mxu1 %v2885_v45 }
 0x7f3   :  { %1029 = vadd.xlane.f32.xlu0 %v1028_v42  ;;  %v1025_v43 = vsel %vm128_vm0, %v1023_v41, 0.0  ;;  %2888 = vmatpush3.bf16.msra.mxu1 %v2885_v45 }
 0x7f4   :  { %1026 = vadd.xlane.f32.xlu1 %v1025_v43  ;;  %2890 = vmatprep.subr.bf16.mxu1 %v2889_v47 }
 0x7f7   :  { %2892 = vmatpush3.bf16.msra.mxu1 %v2889_v47 }
 0x880   :  { %v1030_v48 = vpop.xlane.xlu0 %1029 }
 0x881   :  { %v1032_v50 = vmul.f32 0.03125, %v1030_v48  ;;  %v1027_v53 = vpop.xlane.xlu1 %1026  ;;  %v2457_v48 = vld [vmem:[%s3862_s7 + $0x38] sm:$0xff] }
 0x882   :  { %v1031_v54 = vmul.f32 0.03125, %v1027_v53 }
 0x883   :  { %v1034_v55 = vadd.f32 1e-05, %v1032_v50  ;;  %v2913_v50 = vpack.c.bf16 %v2457_v48, %v2456_v46 }
 0x884   :  { %v1033_v56 = vadd.f32 1e-05, %v1031_v54 }
 0x885   :  { %3060 = vrsqrt.f32 %v1034_v55 }
 0x886   :  { %3062 = vrsqrt.f32 %v1033_v56 }
 0x88f   :  { %v3061_v57 = vpop.eup %3060 }
 0x890   :  { %v3063_v58 = vpop.eup %3062  ;;  %v1038_v60 = vmul.f32 %v3061_v57, %v3577_v33 }
 0x891   :  { %v1037_v61 = vmul.f32 %v3063_v58, %v3580_v38 }
 0x892   :  { %v1046_v63 = vmul.f32 %v2445_v59, %v1038_v60 }
 0x893   :  { %v1045_v62 = vmul.f32 %v2445_v59, %v1037_v61  ;;  %v2453_v61 = vld [vmem:[%s3860_s5 + $0x1] ss:$0 sm:$0xff] }
 0x895   :  { %2706 = vmatprep.mubr.msk.f32.mxu1 %vm128_vm0, %v1045_v62 }
 0x896   :  { %2707 = vmatmul.mubr.msk.f32.vlgmr.msra.gmra.mrb[8].mxu1 %vm128_vm0, %v1046_v63 }
 0x969   :  { %v2708_v16 = vpop.f32.mrb[8].mxu1 }
 0x96a   :  { %1150 = vrot.lane.b32.xlu0 %v2708_v16, %s3259_s15  ;;  %v1123_v18 = vpop.f32.mrb[9].mxu1  ;;  %v2449_v20 = vmul.f32 -1.442695, %v2708_v16 }
 0x96b   :  { %1148 = vrot.lane.b32.xlu1 %v1123_v18, %s3259_s15  ;;  %v2448_v19 = vmul.f32 -1.442695, %v1123_v18 }
 0x96d   :  { %3064 = vpow2.f32 %v2448_v19 }
 0x96e   :  { %3066 = vpow2.f32 %v2449_v20 }
 0x977   :  { %v3065_v21 = vpop.eup %3064 }
 0x978   :  { %v3067_v22 = vpop.eup %3066  ;;  %v1138_v23 = vadd.f32 1.0, %v3065_v21 }
 0x979   :  { %v1139_v24 = vadd.f32 1.0, %v3067_v22 }
 0x97a   :  { %3068 = vrcp.f32 %v1138_v23 }
 0x97b   :  { %3070 = vrcp.f32 %v1139_v24 }
 0x984   :  { %v3069_v25 = vpop.eup %3068 }
 0x985   :  { %v3071_v26 = vpop.eup %3070  ;;  %v1144_v28 = vmul.f32 %v3069_v25, %v1123_v18 }
 0x986   :  { %v1145_v29 = vmul.f32 %v3071_v26, %v2708_v16 }
 0x9dc   :  { %v1151_v27 = vpop.permute.xlu0 %1150 }
 0x9dd   :  { %v1149_v30 = vpop.permute.xlu1 %1148  ;;  %v1155_v34 = vmul.f32 %v1151_v27, %v1145_v29 }
 0x9de   :  { %v1154_v32 = vmul.f32 %v1149_v30, %v1144_v28 }
 0x9e0   :  { %2725 = vmatprep.mubr.msk.f32.mxu0 %vm1164_vm4, %v1154_v32 }
 0x9e1   :  { %2726 = vmatmul.mubr.msk.f32.vlgmr.msra.gmra.mrb[8].mxu0 %vm1164_vm4, %v1155_v34 }
 0x9e2   :  { %2928 = vmatpush3.bf16.msra.mxu0 %v3449_v15 }
 0x9e3   :  { %2930 = vmatprep.subr.bf16.mxu0 %v3462_v31 }
 0x9e6   :  { %2932 = vmatpush3.bf16.msra.mxu0 %v3462_v31 }
 0xab4   :  { %v2727_v39 = vpop.f32.mrb[8].mxu0 }
 0xab5   :  { %v3640_v41 = vadd.f32 %v2727_v39, %v3577_v33  ;;  %v1237_v42 = vpop.f32.mrb[9].mxu0  ;;  %v2454_v33 = vld [vmem:[%s3862_s7 + $0x20] sm:$0xff] }
 0xab6   :  { %v3643_v43 = vadd.f32 %v1237_v42, %v3580_v38  ;;  %v2455_v38 = vld [vmem:[%s3862_s7 + $0x28] sm:$0xff] }
 0xab7   :  { %v1251_v1 = vmul.f32 %v3640_v41, %v3640_v41  ;;  %v2909_v47 = vpack.c.bf16 %v2455_v38, %v2454_v33 }
 0xab8   :  { %v1250_v0 = vmul.f32 %v3643_v43, %v3643_v43 }
 0xab9   :  { %v1255_v44 = vsel %vm128_vm0, %v1251_v1, 0.0  ;;  %2910 = vmatprep.subr.bf16.mxu1 %v2909_v47 }
 0xaba   :  { %1256 = vadd.xlane.f32.xlu0 %v1255_v44  ;;  %v1252_v45 = vsel %vm128_vm0, %v1250_v0, 0.0  ;;  %2912 = vmatpush3.bf16.msra.mxu1 %v2909_v47 }
 0xabb   :  { %1253 = vadd.xlane.f32.xlu1 %v1252_v45  ;;  %2914 = vmatprep.subr.bf16.mxu1 %v2913_v50 }
 0xabe   :  { %2916 = vmatpush3.bf16.msra.mxu1 %v2913_v50 }
 0xabf   :  { %2918 = vmatprep.subr.bf16.mxu1 %v3449_v15 }
 0xb47   :  { %v1257_v53 = vpop.xlane.xlu0 %1256 }
 0xb48   :  { %v1259_v54 = vmul.f32 0.03125, %v1257_v53  ;;  %v1254_v55 = vpop.xlane.xlu1 %1253 }
 0xb49   :  { %v1258_v56 = vmul.f32 0.03125, %v1254_v55 }
 0xb4a   :  { %v1261_v57 = vadd.f32 1e-05, %v1259_v54 }
 0xb4b   :  { %v1260_v58 = vadd.f32 1e-05, %v1258_v56 }
 0xb4c   :  { %3072 = vrsqrt.f32 %v1261_v57 }
 0xb4d   :  { %3074 = vrsqrt.f32 %v1260_v58 }
 0xb56   :  { %v3073_v59 = vpop.eup %3072 }
 0xb57   :  { %v3075_v60 = vpop.eup %3074  ;;  %v1265_v62 = vmul.f32 %v3073_v59, %v3640_v41 }
 0xb58   :  { %v1264_v63 = vmul.f32 %v3075_v60, %v3643_v43 }
 0xb59   :  { %v1273_v4 = vmul.f32 %v2453_v61, %v1265_v62 }
 0xb5a   :  { %v1272_v2 = vmul.f32 %v2453_v61, %v1264_v63 }
 0xb5c   :  { %2736 = vmatprep.mubr.msk.f32.mxu1 %vm128_vm0, %v1272_v2 }
 0xb5d   :  { %2737 = vmatmul.mubr.msk.f32.vlgmr.msra.gmra.mrb[10].mxu1 %vm128_vm0, %v1273_v4 }
 0xb5e   :  { %2920 = vmatpush3.bf16.msra.mxu1 %v3449_v15 }
 0xb5f   :  { %2922 = vmatprep.subr.bf16.mxu1 %v3462_v31 }
 0xb62   :  { %2924 = vmatpush3.bf16.msra.mxu1 %v3462_v31 }
 0xc30   :  { %v2738_v6 = vpop.f32.mrb[10].mxu1 }
 0xc31   :  { %v3677_v7 = vadd.f32 %v2738_v6, %v2459_v5  ;;  %v1359_v35 = vpop.f32.mrb[11].mxu1 }
 0xc32   :  { %v3679_v36 = vadd.f32 %v2459_v5, %v1359_v35 }
 0xc33   :  { %1459 = vrot.lane.b32.xlu0 %v3677_v7, %s3256_s14  ;;  %v1369_v27 = vmul.f32 %v3677_v7, %v3483_v37 }
 0xc34   :  { %1457 = vrot.lane.b32.xlu1 %v3679_v36, %s3256_s14  ;;  %2747 = vmatprep.mubr.msk.f32.mxu1 %vm128_vm0, %v3679_v36  ;;  %v1368_v10 = vmul.f32 %v3679_v36, %v3445_v12  ;;  %v1455_v22 = vmul.f32 %v3679_v36, %v3502_v51  ;;  %v1456_v12 = vmul.f32 %v3677_v7, %v3504_v52 }
 0xc35   :  { %2748 = vmatmul.mubr.msk.f32.vlgmr.msra.gmra.mrb[12].mxu1 %vm128_vm0, %v3677_v7 }
 0xca5   :  { %v1460_v31 = vpop.permute.xlu0 %1459 }
 0xca6   :  { %v1458_v15 = vpop.permute.xlu1 %1457 }
 0xca7   :  { %2758 = vmatprep.mubr.msk.f32.mxu0 %vm128_vm0, %v1458_v15 }
 0xca8   :  { %2759 = vmatmul.mubr.msk.f32.vlgmr.msra.gmra.mrb[10].mxu0 %vm128_vm0, %v1460_v31 }
 0xd08   :  { %v2749_v8 = vpop.f32.mrb[12].mxu1 }
 0xd09   :  { %v1442_v9 = vpop.f32.mrb[13].mxu1 }
 0xd0a   :  { %v1451_v11 = vmul.f32 %v1442_v9, %v3489_v40 }
 0xd0c   :  { %v1453_v14 = vadd.f32 %v1451_v11, %v1368_v10 }
 0xd0e   :  { %2765 = vmatprep.mubr.msk.f32.mxu1 %vm455_vm1, %v1453_v14 }
 0xd7b   :  { %v2760_v16 = vpop.f32.mrb[10].mxu0 }
 0xd7c   :  { %v1531_v18 = vpop.f32.mrb[11].mxu0  ;;  %v1541_v20 = vmul.f32 %v2760_v16, %v3498_v49  ;;  %v3030_v16 = vpack.i.bf16 %v3677_v7, %v3679_v36 }
 0xd7d   :  { %v1540_v19 = vmul.f32 %v1531_v18, %v3489_v40  ;;  %v1452_v40 = vmul.f32 %v2749_v8, %v3498_v49 }
 0xd7f   :  { %1544 = vrot.lane.b32.xlu1 %v1540_v19, %s3255_s0  ;;  %v1454_v51 = vadd.f32 %v1452_v40, %v1369_v27 }
 0xd83   :  { %1546 = vrot.lane.b32.xlu1 %v1541_v20, %s3255_s0 }
 0xdf1   :  { %v1545_v21 = vpop.permute.xlu1 %1544 }
 0xdf2   :  { %v3703_v24 = vadd.f32 %v1545_v21, %v1455_v22 }
 0xdf5   :  { %v1547_v23 = vpop.permute.xlu1 %1546 }
 0xdf6   :  { %v3705_v25 = vadd.f32 %v1547_v23, %v1456_v12 }
 0xdf8   :  { %v3025_v26 = vpack.i.bf16 %v3705_v25, %v3703_v24 }
 0xdfa   :  { %3026 = vrot.lane.b32.xlu1 %v3025_v26, %s3258_s28  ;;  %3021 = vrot.lane.b32.xlu0 %v3025_v26, %s3256_s14 }
 0xdfe   :  { %1781 = vrot.lane.b32.xlu1 %v1454_v51, %s3257_s3  ;;  %1779 = vrot.lane.b32.xlu0 %v1453_v14, %s3257_s3 }
 0xe6c   :  { %v3027_v52 = vpop.permute.xlu1 %3026  ;;  %v3022_v28 = vpop.permute.xlu0 %3021 }
 0xe6d   :  { %v3029_v29 = vunpack.i.h.bf16 %v3027_v52  ;;  %v3028_v30 = vunpack.i.l.bf16 %v3027_v52  ;;  %v3024_v49 = vunpack.i.h.bf16 %v3022_v28  ;;  %v3023_v32 = vunpack.i.l.bf16 %v3022_v28 }
 0xe6f   :  { %v2933_v34 = vpack.c.bf16 %v3024_v49, %v3023_v32  ;;  %v2943_v39 = vpack.c.bf16 %v3029_v29, %v3028_v30 }
 0xe70   :  { %v1780_v37 = vpop.permute.xlu0 %1779  ;;  %v1782_v42 = vpop.permute.xlu1 %1781 }
 0xe71   :  { %2935 = vmatprep.subr.msk.bf16.mxu1 %vm3520_vm3, %v2933_v34 }
 0xe72   :  { %2938 = vmatpush3.bf16.xpose.msk.msra.mxu1 %vm3520_vm3, %v2933_v34 }
 0xe73   :  { %2945 = vmatprep.subr.msk.bf16.mxu1 %vm3520_vm3, %v2943_v39 }
 0xe79   :  { %2766 = vmatmul.mubr.msk.f32.vlgmr.msra.gmra.mrb[14].mxu1 %vm455_vm1, %v1454_v51 }
 0xe7a   :  { %2948 = vmatpush3.bf16.xpose.msk.msra.mxu1 %vm3520_vm3, %v2943_v39  ;;  %2779 = vmatprep.mubr.msk.f32.mxu1 %vm455_vm1, %v1780_v37 }
 0xe81   :  { %2780 = vmatmul.mubr.msk.f32.vlgmr.msra.gmra.mrb[16].mxu1 %vm455_vm1, %v1782_v42  ;;  %v2468_v42 = vld [vmem:[%s3864_s9 + $0x30] sm:$0xff] }
 0xf4c   :  { %v2767_v1 = vpop.f32.mrb[14].mxu1 }
 0xf4d   :  { %v1667_v0 = vmul.f32 0.25, %v2767_v1  ;;  %v1657_v44 = vpop.f32.mrb[15].mxu1  ;;  %v2469_v1 = vld [vmem:[%s3864_s9 + $0x38] sm:$0xff] }
 0xf4e   :  { %v1666_v45 = vmul.f32 0.25, %v1657_v44  ;;  %v2466_v44 = vld [vmem:[%s3864_s9 + $0x20] sm:$0xff] }
 0xf4f   :  { %v1669_v33 = vadd.f32 %v1667_v0, %v3536_v13  ;;  %v2953_v0 = vpack.c.bf16 %v2469_v1, %v2468_v42 }
 0xf50   :  { %v1668_v38 = vadd.f32 %v1666_v45, %v3538_v17  ;;  %v2467_v45 = vld [vmem:[%s3864_s9 + $0x28] sm:$0xff] }
 0xf51   :  { %v1673_v46 = vsel %vm455_vm1, %v1669_v33, -inf }
 0xf52   :  { %1674 = vmax.xlane.f32.xlu1 %v1673_v46  ;;  %v1670_v47 = vsel %vm455_vm1, %v1668_v38, -inf }
 0xf53   :  { %1671 = vmax.xlane.f32.xlu0 %v1670_v47 }
 0xf54   :  { %v2781_v3 = vpop.f32.mrb[16].mxu1 }
 0xf55   :  { %v1861_v48 = vpop.f32.mrb[17].mxu1  ;;  %v1871_v50 = vmul.f32 0.25, %v2781_v3 }
 0xf56   :  { %v1870_v53 = vmul.f32 0.25, %v1861_v48 }
 0xf57   :  { %v1873_v56 = vadd.f32 %v1871_v50, %v3536_v13 }
 0xf58   :  { %v1872_v54 = vadd.f32 %v1870_v53, %v3538_v17 }
 0xf59   :  { %v1877_v57 = vsel %vm455_vm1, %v1873_v56, -inf }
 0xf5a   :  { %v1874_v55 = vsel %vm455_vm1, %v1872_v54, -inf }
 0xf5b   :  { %1875 = vmax.xlane.f32.xlu0 %v1874_v55 }
 0xf5f   :  { %1878 = vmax.xlane.f32.xlu0 %v1877_v57 }
 0xfdf   :  { %v1675_v58 = vpop.xlane.xlu1 %1674 }
 0xfe0   :  { %v1677_v59 = vsub.f32 %v1669_v33, %v1675_v58  ;;  %v1672_v60 = vpop.xlane.xlu0 %1671  ;;  %v2957_v33 = vpack.c.bf16 %v2467_v45, %v2466_v44 }
 0xfe1   :  { %v1676_v61 = vsub.f32 %v1668_v38, %v1672_v60 }
 0xfe2   :  { %v1680_v62 = vmul.f32 1.442695, %v1677_v59  ;;  %v2490_v59 = vld [vmem:[%s3865_s10 + $0x30] sm:$0xff] }
 0xfe3   :  { %v1678_v63 = vmul.f32 1.442695, %v1676_v61  ;;  %v2491_v61 = vld [vmem:[%s3865_s10 + $0x38] sm:$0xff] }
 0xfe4   :  { %3076 = vpow2.f32 %v1680_v62  ;;  %v2965_v62 = vpack.c.bf16 %v2491_v61, %v2490_v59 }
 0xfe5   :  { %3078 = vpow2.f32 %v1678_v63 }
 0xfe8   :  { %v1876_v2 = vpop.xlane.xlu0 %1875 }
 0xfe9   :  { %v1880_v4 = vsub.f32 %v1872_v54, %v1876_v2 }
 0xfeb   :  { %v1882_v5 = vmul.f32 1.442695, %v1880_v4 }
 0xfec   :  { %v1879_v17 = vpop.xlane.xlu0 %1878 }
 0xfed   :  { %3080 = vpow2.f32 %v1882_v5  ;;  %v1881_v6 = vsub.f32 %v1873_v56, %v1879_v17 }
 0xfee   :  { %v3077_v35 = vpop.eup %3076 }
 0xfef   :  { %v3079_v13 = vpop.eup %3078  ;;  %v1884_v15 = vmul.f32 1.442695, %v1881_v6  ;;  %v1685_v31 = vsel %vm455_vm1, %v3077_v35, 0.0 }
 0xff0   :  { %1686 = vadd.xlane.f32.xlu0 %v1685_v31  ;;  %v1682_v8 = vsel %vm455_vm1, %v3079_v13, 0.0 }
 0xff1   :  { %3082 = vpow2.f32 %v1884_v15  ;;  %1683 = vadd.xlane.f32.xlu1 %v1682_v8  ;;  %v2487_v15 = vld [vmem:[%s3861_s6 + $0x1] ss:$0 sm:$0xff] }
 0xff7   :  { %v3081_v9 = vpop.eup %3080 }
 0xff8   :  { %v1886_v10 = vsel %vm455_vm1, %v3081_v9, 0.0 }
 0xff9   :  { %1887 = vadd.xlane.f32.xlu1 %v1886_v10 }
 0xffb   :  { %v3083_v11 = vpop.eup %3082 }
 0xffc   :  { %v1889_v14 = vsel %vm455_vm1, %v3083_v11, 0.0 }
 0xffd   :  { %1890 = vadd.xlane.f32.xlu0 %v1889_v14  ;;  %v2497_v14 = vld [vmem:[%s3866_s11 + $0x48] sm:$0xff] }
0x100a   :  { %3031 = vrot.lane.b32.xlu1 %v3030_v16, %s3259_s15 }
0x1013   :  { %3036 = vrot.lane.b32.xlu0 %v3030_v16, %s3260_s16  ;;  %v2498_v16 = vld [vmem:[%s3866_s11 + $0x50] sm:$0xff] }
0x107d   :  { %v1687_v19 = vpop.xlane.xlu0 %1686 }
0x107e   :  { %v1684_v18 = vpop.xlane.xlu1 %1683 }
0x107f   :  { %3084 = vrcp.f32 %v1684_v18 }
0x1080   :  { %3086 = vrcp.f32 %v1687_v19  ;;  %v2499_v19 = vld [vmem:[%s3866_s11 + $0x58] sm:$0xff] }
0x1086   :  { %v1888_v20 = vpop.xlane.xlu1 %1887 }
0x1087   :  { %3088 = vrcp.f32 %v1888_v20  ;;  %v2973_v20 = vpack.c.bf16 %v2499_v19, %v2498_v16 }
0x1089   :  { %v3085_v21 = vpop.eup %3084 }
0x108a   :  { %v3032_v22 = vpop.permute.xlu1 %3031  ;;  %v1891_v12 = vpop.xlane.xlu0 %1890  ;;  %v1690_v23 = vmul.f32 %v3085_v21, %v3079_v13  ;;  %v2500_v21 = vld [vmem:[%s3866_s11 + $0x60] sm:$0xff] }
0x108b   :  { %v3034_v40 = vunpack.i.h.bf16 %v3032_v22  ;;  %v3033_v26 = vunpack.i.l.bf16 %v3032_v22  ;;  %3090 = vrcp.f32 %v1891_v12  ;;  %v3087_v51 = vpop.eup %3086  ;;  %v2501_v22 = vld [vmem:[%s3866_s11 + $0x68] sm:$0xff] }
0x108c   :  { %2772 = vmatprep.mubr.msk.f32.mxu0 %vm455_vm1, %v1690_v23  ;;  %v1691_v49 = vmul.f32 %v3087_v51, %v3077_v35  ;;  %v2977_v12 = vpack.c.bf16 %v2501_v22, %v2500_v21  ;;  %v2502_v23 = vld [vmem:[%s3866_s11 + $0x70] sm:$0xff] }
0x108d   :  { %v2939_v27 = vpack.c.bf16 %v3034_v40, %v3033_v26  ;;  %v2503_v40 = vld [vmem:[%s3866_s11 + $0x78] sm:$0xff] }
0x108e   :  { %v3037_v52 = vpop.permute.xlu0 %3036  ;;  %v2981_v26 = vpack.c.bf16 %v2503_v40, %v2502_v23 }
0x108f   :  { %v3039_v28 = vunpack.i.h.bf16 %v3037_v52  ;;  %v3038_v29 = vunpack.i.l.bf16 %v3037_v52  ;;  %2940 = vmatprep.subr.bf16.mxu0 %v2939_v27 }
0x1090   :  { %2942 = vmatpush3.bf16.msra.mxu0 %v2939_v27 }
0x1091   :  { %v3089_v30 = vpop.eup %3088  ;;  %v2949_v32 = vpack.c.bf16 %v3039_v28, %v3038_v29 }
0x1092   :  { %v1894_v34 = vmul.f32 %v3089_v30, %v3081_v9 }
0x1093   :  { %2773 = vmatmul.mubr.msk.f32.vlgmr.msra.gmra.mrb[12].mxu0 %vm455_vm1, %v1691_v49  ;;  %2950 = vmatprep.subr.bf16.mxu0 %v2949_v32 }
0x1094   :  { %2952 = vmatpush3.bf16.msra.mxu0 %v2949_v32  ;;  %2786 = vmatprep.mubr.msk.f32.mxu0 %vm455_vm1, %v1894_v34 }
0x1095   :  { %v3091_v39 = vpop.eup %3090  ;;  %2954 = vmatprep.subr.bf16.mxu0 %v2953_v0 }
0x1096   :  { %v1895_v37 = vmul.f32 %v3091_v39, %v3083_v11  ;;  %v2496_v11 = vld [vmem:[%s3866_s11 + $0x40] sm:$0xff] }
0x1097   :  { %v2969_v18 = vpack.c.bf16 %v2497_v14, %v2496_v11 }
0x1098   :  { %2787 = vmatmul.mubr.msk.f32.vlgmr.msra.gmra.mrb[14].mxu0 %vm455_vm1, %v1895_v37 }
0x1099   :  { %2956 = vmatpush3.bf16.msra.mxu0 %v2953_v0 }
0x109a   :  { %2958 = vmatprep.subr.bf16.mxu0 %v2957_v33 }
0x1166   :  { %v2774_v38 = vpop.f32.mrb[12].mxu0 }
0x1167   :  { %v1770_v46 = vpop.f32.mrb[13].mxu0 }
0x116b   :  { %v2788_v47 = vpop.f32.mrb[14].mxu0 }
0x116c   :  { %v1974_v3 = vpop.f32.mrb[15].mxu0 }
0x116d   :  { %2793 = vmatprep.mubr.msk.f32.mxu0 %vm455_vm1, %v1974_v3 }
0x116e   :  { %2794 = vmatmul.mubr.msk.f32.vlgmr.msra.gmra.mrb[16].mxu0 %vm455_vm1, %v2788_v47 }
0x116f   :  { %2960 = vmatpush3.bf16.msra.mxu0 %v2957_v33  ;;  %2800 = vmatprep.mubr.msk.f32.mxu0 %vm455_vm1, %v1770_v46 }
0x1170   :  { %2970 = vmatprep.subr.bf16.mxu0 %v2969_v18 }
0x1176   :  { %2801 = vmatmul.mubr.msk.f32.vlgmr.msra.gmra.mrb[16].mxu0 %vm455_vm1, %v2774_v38 }
0x1177   :  { %2972 = vmatpush3.bf16.msra.mxu0 %v2969_v18 }
0x1178   :  { %2974 = vmatprep.subr.bf16.mxu0 %v2973_v20 }
0x117b   :  { %2976 = vmatpush3.bf16.msra.mxu0 %v2973_v20 }
0x117c   :  { %2978 = vmatprep.subr.bf16.mxu0 %v2977_v12 }
0x117f   :  { %2980 = vmatpush3.bf16.msra.mxu0 %v2977_v12 }
0x1180   :  { %2982 = vmatprep.subr.bf16.mxu0 %v2981_v26 }
0x1183   :  { %2984 = vmatpush3.bf16.msra.mxu0 %v2981_v26 }
0x1249   :  { %v2802_v48 = vpop.f32.mrb[16].mxu0 }
0x124a   :  { %v3764_v50 = vadd.f32 %v2802_v48, %v3640_v41  ;;  %v2136_v53 = vpop.f32.mrb[17].mxu0  ;;  %v2488_v41 = vld [vmem:[%s3865_s10 + $0x20] sm:$0xff] }
0x124b   :  { %v3767_v54 = vadd.f32 %v2136_v53, %v3643_v43  ;;  %v2489_v43 = vld [vmem:[%s3865_s10 + $0x28] sm:$0xff] }
0x124c   :  { %v2150_v55 = vmul.f32 %v3764_v50, %v3764_v50  ;;  %v2961_v60 = vpack.c.bf16 %v2489_v43, %v2488_v41 }
0x124d   :  { %v2149_v56 = vmul.f32 %v3767_v54, %v3767_v54 }
0x124e   :  { %v2154_v57 = vsel %vm128_vm0, %v2150_v55, 0.0  ;;  %2962 = vmatprep.subr.bf16.mxu1 %v2961_v60 }
0x124f   :  { %2155 = vadd.xlane.f32.xlu0 %v2154_v57  ;;  %v2151_v58 = vsel %vm128_vm0, %v2149_v56, 0.0  ;;  %2964 = vmatpush3.bf16.msra.mxu1 %v2961_v60 }
0x1250   :  { %2152 = vadd.xlane.f32.xlu1 %v2151_v58  ;;  %2966 = vmatprep.subr.bf16.mxu1 %v2965_v62 }
0x1253   :  { %2968 = vmatpush3.bf16.msra.mxu1 %v2965_v62 }
0x12dc   :  { %v2156_v63 = vpop.xlane.xlu0 %2155 }
0x12dd   :  { %v2158_v2 = vmul.f32 0.03125, %v2156_v63  ;;  %v2153_v4 = vpop.xlane.xlu1 %2152 }
0x12de   :  { %v2157_v5 = vmul.f32 0.03125, %v2153_v4 }
0x12df   :  { %v2160_v17 = vadd.f32 1e-05, %v2158_v2 }
0x12e0   :  { %v2159_v6 = vadd.f32 1e-05, %v2157_v5 }
0x12e1   :  { %3092 = vrsqrt.f32 %v2160_v17 }
0x12e2   :  { %3094 = vrsqrt.f32 %v2159_v6 }
0x12eb   :  { %v3093_v35 = vpop.eup %3092 }
0x12ec   :  { %v3095_v13 = vpop.eup %3094  ;;  %v2164_v31 = vmul.f32 %v3093_v35, %v3764_v50 }
0x12ed   :  { %v2163_v8 = vmul.f32 %v3095_v13, %v3767_v54 }
0x12ee   :  { %v2172_v10 = vmul.f32 %v2487_v15, %v2164_v31 }
0x12ef   :  { %v2171_v9 = vmul.f32 %v2487_v15, %v2163_v8 }
0x12f1   :  { %2811 = vmatprep.mubr.msk.f32.mxu1 %vm128_vm0, %v2171_v9 }
0x12f2   :  { %2812 = vmatmul.mubr.msk.f32.vlgmr.msra.gmra.mrb[18].mxu1 %vm128_vm0, %v2172_v10 }
0x13c5   :  { %v2813_v27 = vpop.f32.mrb[18].mxu1 }
0x13c6   :  { %2277 = vrot.lane.b32.xlu0 %v2813_v27, %s3259_s15  ;;  %v2250_v51 = vpop.f32.mrb[19].mxu1  ;;  %v2495_v28 = vmul.f32 -1.442695, %v2813_v27 }
0x13c7   :  { %2275 = vrot.lane.b32.xlu1 %v2250_v51, %s3259_s15  ;;  %v2494_v52 = vmul.f32 -1.442695, %v2250_v51 }
0x13c9   :  { %3096 = vpow2.f32 %v2494_v52 }
0x13ca   :  { %3098 = vpow2.f32 %v2495_v28 }
0x13cb   :  { %1554 = vrot.lane.b32.xlu1 %v3703_v24, %s3255_s0 }
0x13cf   :  { %1563 = vrot.lane.b32.xlu1 %v3679_v36, %s3255_s0 }
0x13d3   :  { %v3097_v29 = vpop.eup %3096 }
0x13d4   :  { %v3099_v30 = vpop.eup %3098  ;;  %v2265_v49 = vadd.f32 1.0, %v3097_v29 }
0x13d5   :  { %v2266_v32 = vadd.f32 1.0, %v3099_v30 }
0x13d6   :  { %3100 = vrcp.f32 %v2265_v49 }
0x13d7   :  { %3102 = vrcp.f32 %v2266_v32 }
0x13e0   :  { %v3101_v34 = vpop.eup %3100 }
0x13e1   :  { %v3103_v39 = vpop.eup %3102  ;;  %v2271_v37 = vmul.f32 %v3101_v34, %v2250_v51 }
0x13e2   :  { %v2272_v1 = vmul.f32 %v3103_v39, %v2813_v27 }
0x1438   :  { %v2278_v42 = vpop.permute.xlu0 %2277 }
0x1439   :  { %v2276_v0 = vpop.permute.xlu1 %2275  ;;  %v2282_v44 = vmul.f32 %v2278_v42, %v2272_v1 }
0x143a   :  { %v2281_v24 = vmul.f32 %v2276_v0, %v2271_v37 }
0x143c   :  { %2830 = vmatprep.mubr.msk.f32.mxu0 %vm1164_vm4, %v2281_v24 }
0x143d   :  { %v1555_v36 = vpop.permute.xlu1 %1554  ;;  %2831 = vmatmul.mubr.msk.f32.vlgmr.msra.gmra.mrb[18].mxu0 %vm1164_vm4, %v2282_v44 }
0x143e   :  { %1561 = vst.msk [vmem:[#allocation11] sm:$0xff] %vm1560_vm5, %v1555_v36 }
0x1441   :  { %v1564_v45 = vpop.permute.xlu1 %1563 }
0x1442   :  { %1570 = vst.msk [vmem:[#allocation11] sm:$0xff] %vm1569_vm6, %v1564_v45 }
0x1510   :  { %v2832_v33 = vpop.f32.mrb[18].mxu0 }
0x1511   :  { %v2374_v38 = vadd.f32 %v2832_v33, %v3764_v50  ;;  %v2364_v46 = vpop.f32.mrb[19].mxu0 }
0x1512   :  { %v2373_v47 = vadd.f32 %v2364_v46, %v3767_v54 }
0x1513   :  { %v2377_v3 = vmul.f32 %v2374_v38, %v2374_v38 }
0x1514   :  { %v2376_v48 = vmul.f32 %v2373_v47, %v2373_v47 }
0x1515   :  { %v2381_v53 = vsel %vm128_vm0, %v2377_v3, 0.0 }
0x1516   :  { %2382 = vadd.xlane.f32.xlu0 %v2381_v53  ;;  %v2378_v55 = vsel %vm128_vm0, %v2376_v48, 0.0 }
0x1517   :  { %2379 = vadd.xlane.f32.xlu1 %v2378_v55 }
0x1528   :  { %1565 = vrot.lane.b32.xlu1 %v3677_v7, %s3255_s0  ;;  %v2506_v7 = vld [vmem:[%s3867_s12] ss:$0 sm:$0xff] }
0x152c   :  { %1556 = vrot.lane.b32.xlu0 %v3705_v25, %s3255_s0  ;;  %s3261_s0 = smov [#allocation11]  }
0x152d   :  { %s2407_s9 = sshll.u32 %s3261_s0, 4  ;;  %s2408_s9 = int_to_ptr.vmem [resolvable:$true] %s2407_s9 }
0x152e   :  { %s3218_s30 = scalar_lea.vmem %s2408_s9, 512  ;;  %p3223_p13 = scmp.lt.s32.totalorder %s2408_s9, %s2408_s9 }
0x152f   :  { %p3219_p12 = scmp.ne.s32.totalorder %s2408_s9, %s3218_s30  ;;  %p3224_p0 = scmp.lt.s32.totalorder %s3218_s30, %s3218_s30 }
0x1531   :  { %p3225_p1 = por %p3224_p0, %p3223_p13 }
0x1533   :  { %p3226_p2 = pnand %p3225_p1, %p3219_p12 }
0x15a3   :  { %v2383_v56 = vpop.xlane.xlu0 %2382 }
0x15a4   :  { %v2385_v57 = vmul.f32 0.03125, %v2383_v56  ;;  %v2380_v50 = vpop.xlane.xlu1 %2379 }
0x15a5   :  { %v2384_v58 = vmul.f32 0.03125, %v2380_v50 }
0x15a6   :  { %v2387_v41 = vadd.f32 1e-05, %v2385_v57 }
0x15a7   :  { %v2386_v54 = vadd.f32 1e-05, %v2384_v58  ;;  %v1557_v43 = vpop.permute.xlu0 %1556 }
0x15a8   :  { %3104 = vrsqrt.f32 %v2387_v41  ;;  %1562 = vst.msk [vmem:[#allocation11 + $0x10] sm:$0xff] %vm1560_vm5, %v1557_v43  ;;  %v1566_v59 = vpop.permute.xlu1 %1565 }
0x15a9   :  { %3106 = vrsqrt.f32 %v2386_v54  ;;  %1571 = vst.msk [vmem:[#allocation11 + $0x10] sm:$0xff] %vm1569_vm6, %v1566_v59 }
0x15b2   :  { %v3105_v60 = vpop.eup %3104 }
0x15b3   :  { %v3107_v25 = vpop.eup %3106  ;;  %v2391_v61 = vmul.f32 %v3105_v60, %v2374_v38 }
0x15b4   :  { %v2390_v62 = vmul.f32 %v3107_v25, %v2373_v47 }
0x15b5   :  { %v2399_v63 = vmul.f32 %v2506_v7, %v2391_v61 }
0x15b6   :  { %v2398_v2 = vmul.f32 %v2506_v7, %v2390_v62 }
0x15b7   :  { %2401 = vst.msk [vmem:[#allocation11 + $0x18] sm:$0xff] %vm128_vm0, %v2399_v63 }
0x15b8   :  { %2400 = vst.msk [vmem:[#allocation11 + $0x8] sm:$0xff] %vm128_vm0, %v2398_v2 }
0x15b9   :  { %3229 = shalt.err (!%p3226_p2)
}
0x15ba   :  { %s3230_s26 = scalar_lea.hbm %s3868_s13, 512 }
0x15bb   :  { %p3231_p3 = scmp.ne.s32.totalorder %s3868_s13, %s3230_s26  ;;  %p3234_p4 = scmp.lt.u32.totalorder %s3230_s26, %s3868_s13 }
0x15bd   :  { %p3236_p5 = pnand %p3234_p4, %p3231_p3 }
0x15bf   :  { %3239 = shalt.err (!%p3236_p5)
}
0x15c0   :  { %s3262_s21 = smov 256   ;;  %s3263_s17 = smov 16  }
0x15c1   :  { %2413 = dma.vmem_to_hbm [thread:$0]  %s2408_s9, 512, %s3868_s13, [#allocation4], %s3262_s21, %s3262_s21, %s3263_s17  }
0x15c2   :  { %3246 = dma.done.wait [#allocation4], 512  }
0x15c3   :  { %3247 = vsyncadd [#allocation4], 4294966784 }
0x15c4   :  { %2417 = vsyncpa [#allocation3], 1 }
0x15c5   :  { %2418 = vsyncpa [#allocation6], 1 }
0x15c6   :  { %2419 = vsyncpa [#allocation9], 1 }
0x15c7   :  { %2420 = vsyncpa [#allocation4], 1 }

</bundles_post_ra>
